<compile_context>
chip_gen: v7x
topology: tpu7x:2x2x1
jax: 0.10.0
libtpu: 0.0.40
codegen_flags: <defaults>
</compile_context>

<pallas_src>
import jax
import jax.numpy as jnp
from jax.experimental import pallas as pl
from jax.experimental.pallas import tpu as pltpu


def news_lstm_kernel(x_ref, wih_ref, whh_ref, b_ref, fcw_ref, fcb_ref,
                     out_ref, xp_ref):
    # x_ref:   (T*B, E)  time-major flattened embedded tokens
    # wih_ref: (4, E, H), whh_ref: (4, H, H), b_ref: (4, 1, H)  gate order i,f,g,o
    # fcw_ref: (H, O_pad), fcb_ref: (1, O_pad)
    # out_ref: (B, O_pad)
    # xp_ref:  (4, T*B, H) VMEM scratch for hoisted input projections
    B = out_ref.shape[0]
    TB = x_ref.shape[0]
    T = TB // B
    H = whh_ref.shape[-1]

    x_all = x_ref[...]                                   # (T*B, E)

    # Hoisted input projection: one big matmul per gate instead of T tiny ones.
    for g in range(4):
        xp_ref[g] = (jnp.dot(x_all, wih_ref[g],
                             preferred_element_type=jnp.float32)
                     + b_ref[g])                         # (T*B, H)

    # Recurrent weights, loaded once and kept in registers.
    w_hh = [whh_ref[g] for g in range(4)]                # each (H, H)

    def sigmoid(v):
        # single tanh per gate (one EUP push) instead of exp + reciprocal
        return 0.5 * jnp.tanh(0.5 * v) + 0.5

    def step(t, carry):
        h, c = carry
        row = pl.ds(t * B, B)
        i_g = sigmoid(xp_ref[0, row, :]
                      + jnp.dot(h, w_hh[0], preferred_element_type=jnp.float32))
        f_g = sigmoid(xp_ref[1, row, :]
                      + jnp.dot(h, w_hh[1], preferred_element_type=jnp.float32))
        g_g = jnp.tanh(xp_ref[2, row, :]
                       + jnp.dot(h, w_hh[2], preferred_element_type=jnp.float32))
        o_g = sigmoid(xp_ref[3, row, :]
                      + jnp.dot(h, w_hh[3], preferred_element_type=jnp.float32))
        c_new = f_g * c + i_g * g_g
        h_new = o_g * jnp.tanh(c_new)
        return h_new, c_new

    h0 = jnp.zeros((B, H), jnp.float32)
    c0 = jnp.zeros((B, H), jnp.float32)
    h_last, _ = jax.lax.fori_loop(0, T, step, (h0, c0), unroll=True)

    # Final Linear + Softmax over the lane-dense padded output.
    logits = (jnp.dot(h_last, fcw_ref[...], preferred_element_type=jnp.float32)
              + fcb_ref[...])                            # (B, O_pad)
    m = jnp.max(logits, axis=1, keepdims=True)
    e = jnp.exp(logits - m)
    denom = jnp.sum(e, axis=1, keepdims=True)
    out_ref[...] = e * pl.reciprocal(denom, approx=False)


def news_lstm_forward(text, emb_table, w_ih, w_hh, b_all, fc_w, fc_b):
    """text: (B, T) int32 token ids. Returns softmax probabilities (B, O)."""
    B, T = text.shape
    E = emb_table.shape[1]
    H = w_hh.shape[0]
    O = fc_w.shape[1]
    O_pad = pl.cdiv(O, 128) * 128

    # Embedding gather, time-major directly (no (B,T,E) intermediate+transpose).
    tokens_tm = text.T.reshape(-1)                       # (T*B,)
    x2d = jnp.take(emb_table, tokens_tm, axis=0)         # (T*B, E)

    # Pre-split weights per gate (PyTorch order i, f, g, o) -> lane-aligned
    # per-gate math in the kernel (no 32-lane sub-slices of a 4H vector).
    w_ih4 = w_ih.reshape(E, 4, H).transpose(1, 0, 2)     # (4, E, H)
    w_hh4 = w_hh.reshape(H, 4, H).transpose(1, 0, 2)     # (4, H, H)
    b4 = b_all.reshape(4, 1, H)                          # (4, 1, H)

    # Pad the classifier to a lane-dense width; padded logits get a hugely
    # negative bias so they contribute exp(.)=0 to the softmax.
    fc_w_p = jnp.pad(fc_w, ((0, 0), (0, O_pad - O)))
    fc_b_p = jnp.pad(fc_b, ((0, 0), (0, O_pad - O)), constant_values=-1e30)

    vmem = pltpu.MemorySpace.VMEM
    out_padded = pl.pallas_call(
        news_lstm_kernel,
        out_shape=jax.ShapeDtypeStruct((B, O_pad), jnp.float32),
        in_specs=[pl.BlockSpec(memory_space=vmem)] * 6,
        out_specs=pl.BlockSpec(memory_space=vmem),
        scratch_shapes=[pltpu.VMEM((4, T * B, H), jnp.float32)],
    )(x2d, w_ih4, w_hh4, b4, fc_w_p, fc_b_p)

    return out_padded[:, :O]


def init_params(key, vocab_size, embedding_dim, hidden_dim, output_dim, pad_idx):
    ks = jax.random.split(key, 7)
    k = 1.0 / jnp.sqrt(hidden_dim)

    emb_table = jax.random.normal(ks[0], (vocab_size, embedding_dim),
                                  jnp.float32)
    emb_table = emb_table.at[pad_idx].set(0.0)           # padding_idx row = 0

    # PyTorch LSTM stores weight_ih as (4H, E); we keep (E, 4H) for x @ W.
    w_ih = jax.random.uniform(ks[1], (embedding_dim, 4 * hidden_dim),
                              jnp.float32, -k, k)
    w_hh = jax.random.uniform(ks[2], (hidden_dim, 4 * hidden_dim),
                              jnp.float32, -k, k)
    b_ih = jax.random.uniform(ks[3], (4 * hidden_dim,), jnp.float32, -k, k)
    b_hh = jax.random.uniform(ks[4], (4 * hidden_dim,), jnp.float32, -k, k)
    b_all = (b_ih + b_hh).reshape(1, 4 * hidden_dim)

    kf = 1.0 / jnp.sqrt(hidden_dim)
    fc_w = jax.random.uniform(ks[5], (hidden_dim, output_dim),
                              jnp.float32, -kf, kf)
    fc_b = jax.random.uniform(ks[6], (1, output_dim), jnp.float32, -kf, kf)

    return emb_table, w_ih, w_hh, b_all, fc_w, fc_b


if __name__ == "__main__":
    vocab_size = 50
    embedding_dim = 16
    hidden_dim = 32
    output_dim = 4
    pad_idx = 0
    B, T = 8, 8   # B=8 keeps f32 sublanes fully occupied in the recurrence

    key = jax.random.PRNGKey(0)
    pkey, tkey = jax.random.split(key)
    params = init_params(pkey, vocab_size, embedding_dim, hidden_dim,
                         output_dim, pad_idx)

    text = jax.random.randint(tkey, (B, T), 0, vocab_size, dtype=jnp.int32)

    fwd = jax.jit(news_lstm_forward)
    out = fwd(text, *params)
    out = jax.block_until_ready(out)

    # sanity: softmax rows sum to 1
    assert out.shape == (B, output_dim)
    assert jnp.allclose(jnp.sum(out, axis=1), 1.0, atol=1e-5)
    print("KERNEL_OK")
</pallas_src>

<mosaic_0001>
module attributes {stable_mosaic.version = 11 : i64} {
  func.func @news_lstm_kernel(%arg0: memref<64x16xf32, #tpu.memory_space<vmem>>, %arg1: memref<4x16x32xf32, #tpu.memory_space<vmem>>, %arg2: memref<4x32x32xf32, #tpu.memory_space<vmem>>, %arg3: memref<4x1x32xf32, #tpu.memory_space<vmem>>, %arg4: memref<32x128xf32, #tpu.memory_space<vmem>>, %arg5: memref<1x128xf32, #tpu.memory_space<vmem>>, %arg6: memref<8x128xf32, #tpu.memory_space<vmem>>, %arg7: memref<4x64x32xf32, #tpu.memory_space<vmem>>) attributes {dimension_semantics = [], scalar_prefetch = 0 : i64, scratch_operands = 1 : i64, tpu.core_type = #tpu.core_type<tc>} {
    %c0 = arith.constant 0 : index
    %c0_0 = arith.constant 0 : index
    %0 = vector.load %arg0[%c0, %c0_0] : memref<64x16xf32, #tpu.memory_space<vmem>>, vector<64x16xf32>
    %c0_1 = arith.constant 0 : index
    %c0_2 = arith.constant 0 : index
    %c0_3 = arith.constant 0 : index
    %1 = vector.load %arg1[%c0_1, %c0_2, %c0_3] : memref<4x16x32xf32, #tpu.memory_space<vmem>>, vector<1x16x32xf32>
    %2 = vector.shape_cast %1 : vector<1x16x32xf32> to vector<16x32xf32>
    %cst = arith.constant dense<0.000000e+00> : vector<64x32xf32>
    %3 = tpu.matmul %0, %2, %cst {dimension_numbers = #tpu.dot_dimension_numbers<[1], [0], [0], [1], [0, 0, 1, 1], [], []>} : vector<64x16xf32>, vector<16x32xf32>, vector<64x32xf32> -> vector<64x32xf32>
    %c0_4 = arith.constant 0 : index
    %c0_5 = arith.constant 0 : index
    %c0_6 = arith.constant 0 : index
    %4 = vector.load %arg3[%c0_4, %c0_5, %c0_6] : memref<4x1x32xf32, #tpu.memory_space<vmem>>, vector<1x1x32xf32>
    %5 = vector.shape_cast %4 : vector<1x1x32xf32> to vector<1x32xf32>
    %6 = vector.broadcast %5 : vector<1x32xf32> to vector<64x32xf32>
    %7 = arith.addf %3, %6 : vector<64x32xf32>
    %c0_7 = arith.constant 0 : index
    %c0_8 = arith.constant 0 : index
    %c0_9 = arith.constant 0 : index
    %8 = vector.load %arg7[%c0_7, %c0_8, %c0_9] : memref<4x64x32xf32, #tpu.memory_space<vmem>>, vector<1x64x32xf32>
    %9 = vector.shape_cast %8 : vector<1x64x32xf32> to vector<64x32xf32>
    %10 = vector.shape_cast %7 : vector<64x32xf32> to vector<1x64x32xf32>
    tpu.vector_store %arg7[%c0_7, %c0_8, %c0_9], %10 {strides = array<i32>} : memref<4x64x32xf32, #tpu.memory_space<vmem>>, vector<1x64x32xf32>,
    %c1 = arith.constant 1 : index
    %c0_10 = arith.constant 0 : index
    %c0_11 = arith.constant 0 : index
    %11 = vector.load %arg1[%c1, %c0_10, %c0_11] : memref<4x16x32xf32, #tpu.memory_space<vmem>>, vector<1x16x32xf32>
    %12 = vector.shape_cast %11 : vector<1x16x32xf32> to vector<16x32xf32>
    %cst_12 = arith.constant dense<0.000000e+00> : vector<64x32xf32>
    %13 = tpu.matmul %0, %12, %cst_12 {dimension_numbers = #tpu.dot_dimension_numbers<[1], [0], [0], [1], [0, 0, 1, 1], [], []>} : vector<64x16xf32>, vector<16x32xf32>, vector<64x32xf32> -> vector<64x32xf32>
    %c1_13 = arith.constant 1 : index
    %c0_14 = arith.constant 0 : index
    %c0_15 = arith.constant 0 : index
    %14 = vector.load %arg3[%c1_13, %c0_14, %c0_15] : memref<4x1x32xf32, #tpu.memory_space<vmem>>, vector<1x1x32xf32>
    %15 = vector.shape_cast %14 : vector<1x1x32xf32> to vector<1x32xf32>
    %16 = vector.broadcast %15 : vector<1x32xf32> to vector<64x32xf32>
    %17 = arith.addf %13, %16 : vector<64x32xf32>
    %c1_16 = arith.constant 1 : index
    %c0_17 = arith.constant 0 : index
    %c0_18 = arith.constant 0 : index
    %18 = vector.load %arg7[%c1_16, %c0_17, %c0_18] : memref<4x64x32xf32, #tpu.memory_space<vmem>>, vector<1x64x32xf32>
    %19 = vector.shape_cast %18 : vector<1x64x32xf32> to vector<64x32xf32>
    %20 = vector.shape_cast %17 : vector<64x32xf32> to vector<1x64x32xf32>
    tpu.vector_store %arg7[%c1_16, %c0_17, %c0_18], %20 {strides = array<i32>} : memref<4x64x32xf32, #tpu.memory_space<vmem>>, vector<1x64x32xf32>,
    %c2 = arith.constant 2 : index
    %c0_19 = arith.constant 0 : index
    %c0_20 = arith.constant 0 : index
    %21 = vector.load %arg1[%c2, %c0_19, %c0_20] : memref<4x16x32xf32, #tpu.memory_space<vmem>>, vector<1x16x32xf32>
    %22 = vector.shape_cast %21 : vector<1x16x32xf32> to vector<16x32xf32>
    %cst_21 = arith.constant dense<0.000000e+00> : vector<64x32xf32>
    %23 = tpu.matmul %0, %22, %cst_21 {dimension_numbers = #tpu.dot_dimension_numbers<[1], [0], [0], [1], [0, 0, 1, 1], [], []>} : vector<64x16xf32>, vector<16x32xf32>, vector<64x32xf32> -> vector<64x32xf32>
    %c2_22 = arith.constant 2 : index
    %c0_23 = arith.constant 0 : index
    %c0_24 = arith.constant 0 : index
    %24 = vector.load %arg3[%c2_22, %c0_23, %c0_24] : memref<4x1x32xf32, #tpu.memory_space<vmem>>, vector<1x1x32xf32>
    %25 = vector.shape_cast %24 : vector<1x1x32xf32> to vector<1x32xf32>
    %26 = vector.broadcast %25 : vector<1x32xf32> to vector<64x32xf32>
    %27 = arith.addf %23, %26 : vector<64x32xf32>
    %c2_25 = arith.constant 2 : index
    %c0_26 = arith.constant 0 : index
    %c0_27 = arith.constant 0 : index
    %28 = vector.load %arg7[%c2_25, %c0_26, %c0_27] : memref<4x64x32xf32, #tpu.memory_space<vmem>>, vector<1x64x32xf32>
    %29 = vector.shape_cast %28 : vector<1x64x32xf32> to vector<64x32xf32>
    %30 = vector.shape_cast %27 : vector<64x32xf32> to vector<1x64x32xf32>
    tpu.vector_store %arg7[%c2_25, %c0_26, %c0_27], %30 {strides = array<i32>} : memref<4x64x32xf32, #tpu.memory_space<vmem>>, vector<1x64x32xf32>,
    %c3 = arith.constant 3 : index
    %c0_28 = arith.constant 0 : index
    %c0_29 = arith.constant 0 : index
    %31 = vector.load %arg1[%c3, %c0_28, %c0_29] : memref<4x16x32xf32, #tpu.memory_space<vmem>>, vector<1x16x32xf32>
    %32 = vector.shape_cast %31 : vector<1x16x32xf32> to vector<16x32xf32>
    %cst_30 = arith.constant dense<0.000000e+00> : vector<64x32xf32>
    %33 = tpu.matmul %0, %32, %cst_30 {dimension_numbers = #tpu.dot_dimension_numbers<[1], [0], [0], [1], [0, 0, 1, 1], [], []>} : vector<64x16xf32>, vector<16x32xf32>, vector<64x32xf32> -> vector<64x32xf32>
    %c3_31 = arith.constant 3 : index
    %c0_32 = arith.constant 0 : index
    %c0_33 = arith.constant 0 : index
    %34 = vector.load %arg3[%c3_31, %c0_32, %c0_33] : memref<4x1x32xf32, #tpu.memory_space<vmem>>, vector<1x1x32xf32>
    %35 = vector.shape_cast %34 : vector<1x1x32xf32> to vector<1x32xf32>
    %36 = vector.broadcast %35 : vector<1x32xf32> to vector<64x32xf32>
    %37 = arith.addf %33, %36 : vector<64x32xf32>
    %c3_34 = arith.constant 3 : index
    %c0_35 = arith.constant 0 : index
    %c0_36 = arith.constant 0 : index
    %38 = vector.load %arg7[%c3_34, %c0_35, %c0_36] : memref<4x64x32xf32, #tpu.memory_space<vmem>>, vector<1x64x32xf32>
    %39 = vector.shape_cast %38 : vector<1x64x32xf32> to vector<64x32xf32>
    %40 = vector.shape_cast %37 : vector<64x32xf32> to vector<1x64x32xf32>
    tpu.vector_store %arg7[%c3_34, %c0_35, %c0_36], %40 {strides = array<i32>} : memref<4x64x32xf32, #tpu.memory_space<vmem>>, vector<1x64x32xf32>,
    %c0_37 = arith.constant 0 : index
    %c0_38 = arith.constant 0 : index
    %c0_39 = arith.constant 0 : index
    %41 = vector.load %arg2[%c0_37, %c0_38, %c0_39] : memref<4x32x32xf32, #tpu.memory_space<vmem>>, vector<1x32x32xf32>
    %42 = vector.shape_cast %41 : vector<1x32x32xf32> to vector<32x32xf32>
    %c1_40 = arith.constant 1 : index
    %c0_41 = arith.constant 0 : index
    %c0_42 = arith.constant 0 : index
    %43 = vector.load %arg2[%c1_40, %c0_41, %c0_42] : memref<4x32x32xf32, #tpu.memory_space<vmem>>, vector<1x32x32xf32>
    %44 = vector.shape_cast %43 : vector<1x32x32xf32> to vector<32x32xf32>
    %c2_43 = arith.constant 2 : index
    %c0_44 = arith.constant 0 : index
    %c0_45 = arith.constant 0 : index
    %45 = vector.load %arg2[%c2_43, %c0_44, %c0_45] : memref<4x32x32xf32, #tpu.memory_space<vmem>>, vector<1x32x32xf32>
    %46 = vector.shape_cast %45 : vector<1x32x32xf32> to vector<32x32xf32>
    %c3_46 = arith.constant 3 : index
    %c0_47 = arith.constant 0 : index
    %c0_48 = arith.constant 0 : index
    %47 = vector.load %arg2[%c3_46, %c0_47, %c0_48] : memref<4x32x32xf32, #tpu.memory_space<vmem>>, vector<1x32x32xf32>
    %48 = vector.shape_cast %47 : vector<1x32x32xf32> to vector<32x32xf32>
    %cst_49 = arith.constant 0.000000e+00 : f32
    %49 = vector.broadcast %cst_49 : f32 to vector<8x32xf32>
    %cst_50 = arith.constant 0.000000e+00 : f32
    %50 = vector.broadcast %cst_50 : f32 to vector<8x32xf32>
    %c0_i32 = arith.constant 0 : i32
    %c8_i32 = arith.constant 8 : i32
    %51 = arith.muli %c0_i32, %c8_i32 : i32
    %c0_51 = arith.constant 0 : index
    %52 = arith.index_cast %51 : i32 to index
    %c0_52 = arith.constant 0 : index
    %53 = vector.load %arg7[%c0_51, %52, %c0_52] : memref<4x64x32xf32, #tpu.memory_space<vmem>>, vector<1x8x32xf32>
    %54 = vector.shape_cast %53 : vector<1x8x32xf32> to vector<8x32xf32>
    %cst_53 = arith.constant dense<0.000000e+00> : vector<8x32xf32>
    %55 = tpu.matmul %49, %42, %cst_53 {dimension_numbers = #tpu.dot_dimension_numbers<[1], [0], [0], [1], [0, 0, 1, 1], [], []>} : vector<8x32xf32>, vector<32x32xf32>, vector<8x32xf32> -> vector<8x32xf32>
    %56 = arith.addf %54, %55 : vector<8x32xf32>
    %cst_54 = arith.constant 5.000000e-01 : f32
    %57 = vector.broadcast %cst_54 : f32 to vector<8x32xf32>
    %58 = arith.mulf %57, %56 : vector<8x32xf32>
    %59 = math.tanh %58 : vector<8x32xf32>
    %cst_55 = arith.constant 5.000000e-01 : f32
    %60 = vector.broadcast %cst_55 : f32 to vector<8x32xf32>
    %61 = arith.mulf %60, %59 : vector<8x32xf32>
    %cst_56 = arith.constant 5.000000e-01 : f32
    %62 = vector.broadcast %cst_56 : f32 to vector<8x32xf32>
    %63 = arith.addf %61, %62 : vector<8x32xf32>
    %c1_57 = arith.constant 1 : index
    %64 = arith.index_cast %51 : i32 to index
    %c0_58 = arith.constant 0 : index
    %65 = vector.load %arg7[%c1_57, %64, %c0_58] : memref<4x64x32xf32, #tpu.memory_space<vmem>>, vector<1x8x32xf32>
    %66 = vector.shape_cast %65 : vector<1x8x32xf32> to vector<8x32xf32>
    %cst_59 = arith.constant dense<0.000000e+00> : vector<8x32xf32>
    %67 = tpu.matmul %49, %44, %cst_59 {dimension_numbers = #tpu.dot_dimension_numbers<[1], [0], [0], [1], [0, 0, 1, 1], [], []>} : vector<8x32xf32>, vector<32x32xf32>, vector<8x32xf32> -> vector<8x32xf32>
    %68 = arith.addf %66, %67 : vector<8x32xf32>
    %cst_60 = arith.constant 5.000000e-01 : f32
    %69 = vector.broadcast %cst_60 : f32 to vector<8x32xf32>
    %70 = arith.mulf %69, %68 : vector<8x32xf32>
    %71 = math.tanh %70 : vector<8x32xf32>
    %cst_61 = arith.constant 5.000000e-01 : f32
    %72 = vector.broadcast %cst_61 : f32 to vector<8x32xf32>
    %73 = arith.mulf %72, %71 : vector<8x32xf32>
    %cst_62 = arith.constant 5.000000e-01 : f32
    %74 = vector.broadcast %cst_62 : f32 to vector<8x32xf32>
    %75 = arith.addf %73, %74 : vector<8x32xf32>
    %c2_63 = arith.constant 2 : index
    %76 = arith.index_cast %51 : i32 to index
    %c0_64 = arith.constant 0 : index
    %77 = vector.load %arg7[%c2_63, %76, %c0_64] : memref<4x64x32xf32, #tpu.memory_space<vmem>>, vector<1x8x32xf32>
    %78 = vector.shape_cast %77 : vector<1x8x32xf32> to vector<8x32xf32>
    %cst_65 = arith.constant dense<0.000000e+00> : vector<8x32xf32>
    %79 = tpu.matmul %49, %46, %cst_65 {dimension_numbers = #tpu.dot_dimension_numbers<[1], [0], [0], [1], [0, 0, 1, 1], [], []>} : vector<8x32xf32>, vector<32x32xf32>, vector<8x32xf32> -> vector<8x32xf32>
    %80 = arith.addf %78, %79 : vector<8x32xf32>
    %81 = math.tanh %80 : vector<8x32xf32>
    %c3_66 = arith.constant 3 : index
    %82 = arith.index_cast %51 : i32 to index
    %c0_67 = arith.constant 0 : index
    %83 = vector.load %arg7[%c3_66, %82, %c0_67] : memref<4x64x32xf32, #tpu.memory_space<vmem>>, vector<1x8x32xf32>
    %84 = vector.shape_cast %83 : vector<1x8x32xf32> to vector<8x32xf32>
    %cst_68 = arith.constant dense<0.000000e+00> : vector<8x32xf32>
    %85 = tpu.matmul %49, %48, %cst_68 {dimension_numbers = #tpu.dot_dimension_numbers<[1], [0], [0], [1], [0, 0, 1, 1], [], []>} : vector<8x32xf32>, vector<32x32xf32>, vector<8x32xf32> -> vector<8x32xf32>
    %86 = arith.addf %84, %85 : vector<8x32xf32>
    %cst_69 = arith.constant 5.000000e-01 : f32
    %87 = vector.broadcast %cst_69 : f32 to vector<8x32xf32>
    %88 = arith.mulf %87, %86 : vector<8x32xf32>
    %89 = math.tanh %88 : vector<8x32xf32>
    %cst_70 = arith.constant 5.000000e-01 : f32
    %90 = vector.broadcast %cst_70 : f32 to vector<8x32xf32>
    %91 = arith.mulf %90, %89 : vector<8x32xf32>
    %cst_71 = arith.constant 5.000000e-01 : f32
    %92 = vector.broadcast %cst_71 : f32 to vector<8x32xf32>
    %93 = arith.addf %91, %92 : vector<8x32xf32>
    %94 = arith.mulf %75, %50 : vector<8x32xf32>
    %95 = arith.mulf %63, %81 : vector<8x32xf32>
    %96 = arith.addf %94, %95 : vector<8x32xf32>
    %97 = math.tanh %96 : vector<8x32xf32>
    %98 = arith.mulf %93, %97 : vector<8x32xf32>
    %c1_i32 = arith.constant 1 : i32
    %c8_i32_72 = arith.constant 8 : i32
    %99 = arith.muli %c1_i32, %c8_i32_72 : i32
    %c0_73 = arith.constant 0 : index
    %100 = arith.index_cast %99 : i32 to index
    %c0_74 = arith.constant 0 : index
    %101 = vector.load %arg7[%c0_73, %100, %c0_74] : memref<4x64x32xf32, #tpu.memory_space<vmem>>, vector<1x8x32xf32>
    %102 = vector.shape_cast %101 : vector<1x8x32xf32> to vector<8x32xf32>
    %cst_75 = arith.constant dense<0.000000e+00> : vector<8x32xf32>
    %103 = tpu.matmul %98, %42, %cst_75 {dimension_numbers = #tpu.dot_dimension_numbers<[1], [0], [0], [1], [0, 0, 1, 1], [], []>} : vector<8x32xf32>, vector<32x32xf32>, vector<8x32xf32> -> vector<8x32xf32>
    %104 = arith.addf %102, %103 : vector<8x32xf32>
    %cst_76 = arith.constant 5.000000e-01 : f32
    %105 = vector.broadcast %cst_76 : f32 to vector<8x32xf32>
    %106 = arith.mulf %105, %104 : vector<8x32xf32>
    %107 = math.tanh %106 : vector<8x32xf32>
    %cst_77 = arith.constant 5.000000e-01 : f32
    %108 = vector.broadcast %cst_77 : f32 to vector<8x32xf32>
    %109 = arith.mulf %108, %107 : vector<8x32xf32>
    %cst_78 = arith.constant 5.000000e-01 : f32
    %110 = vector.broadcast %cst_78 : f32 to vector<8x32xf32>
    %111 = arith.addf %109, %110 : vector<8x32xf32>
    %c1_79 = arith.constant 1 : index
    %112 = arith.index_cast %99 : i32 to index
    %c0_80 = arith.constant 0 : index
    %113 = vector.load %arg7[%c1_79, %112, %c0_80] : memref<4x64x32xf32, #tpu.memory_space<vmem>>, vector<1x8x32xf32>
    %114 = vector.shape_cast %113 : vector<1x8x32xf32> to vector<8x32xf32>
    %cst_81 = arith.constant dense<0.000000e+00> : vector<8x32xf32>
    %115 = tpu.matmul %98, %44, %cst_81 {dimension_numbers = #tpu.dot_dimension_numbers<[1], [0], [0], [1], [0, 0, 1, 1], [], []>} : vector<8x32xf32>, vector<32x32xf32>, vector<8x32xf32> -> vector<8x32xf32>
    %116 = arith.addf %114, %115 : vector<8x32xf32>
    %cst_82 = arith.constant 5.000000e-01 : f32
    %117 = vector.broadcast %cst_82 : f32 to vector<8x32xf32>
    %118 = arith.mulf %117, %116 : vector<8x32xf32>
    %119 = math.tanh %118 : vector<8x32xf32>
    %cst_83 = arith.constant 5.000000e-01 : f32
    %120 = vector.broadcast %cst_83 : f32 to vector<8x32xf32>
    %121 = arith.mulf %120, %119 : vector<8x32xf32>
    %cst_84 = arith.constant 5.000000e-01 : f32
    %122 = vector.broadcast %cst_84 : f32 to vector<8x32xf32>
    %123 = arith.addf %121, %122 : vector<8x32xf32>
    %c2_85 = arith.constant 2 : index
    %124 = arith.index_cast %99 : i32 to index
    %c0_86 = arith.constant 0 : index
    %125 = vector.load %arg7[%c2_85, %124, %c0_86] : memref<4x64x32xf32, #tpu.memory_space<vmem>>, vector<1x8x32xf32>
    %126 = vector.shape_cast %125 : vector<1x8x32xf32> to vector<8x32xf32>
    %cst_87 = arith.constant dense<0.000000e+00> : vector<8x32xf32>
    %127 = tpu.matmul %98, %46, %cst_87 {dimension_numbers = #tpu.dot_dimension_numbers<[1], [0], [0], [1], [0, 0, 1, 1], [], []>} : vector<8x32xf32>, vector<32x32xf32>, vector<8x32xf32> -> vector<8x32xf32>
    %128 = arith.addf %126, %127 : vector<8x32xf32>
    %129 = math.tanh %128 : vector<8x32xf32>
    %c3_88 = arith.constant 3 : index
    %130 = arith.index_cast %99 : i32 to index
    %c0_89 = arith.constant 0 : index
    %131 = vector.load %arg7[%c3_88, %130, %c0_89] : memref<4x64x32xf32, #tpu.memory_space<vmem>>, vector<1x8x32xf32>
    %132 = vector.shape_cast %131 : vector<1x8x32xf32> to vector<8x32xf32>
    %cst_90 = arith.constant dense<0.000000e+00> : vector<8x32xf32>
    %133 = tpu.matmul %98, %48, %cst_90 {dimension_numbers = #tpu.dot_dimension_numbers<[1], [0], [0], [1], [0, 0, 1, 1], [], []>} : vector<8x32xf32>, vector<32x32xf32>, vector<8x32xf32> -> vector<8x32xf32>
    %134 = arith.addf %132, %133 : vector<8x32xf32>
    %cst_91 = arith.constant 5.000000e-01 : f32
    %135 = vector.broadcast %cst_91 : f32 to vector<8x32xf32>
    %136 = arith.mulf %135, %134 : vector<8x32xf32>
    %137 = math.tanh %136 : vector<8x32xf32>
    %cst_92 = arith.constant 5.000000e-01 : f32
    %138 = vector.broadcast %cst_92 : f32 to vector<8x32xf32>
    %139 = arith.mulf %138, %137 : vector<8x32xf32>
    %cst_93 = arith.constant 5.000000e-01 : f32
    %140 = vector.broadcast %cst_93 : f32 to vector<8x32xf32>
    %141 = arith.addf %139, %140 : vector<8x32xf32>
    %142 = arith.mulf %123, %96 : vector<8x32xf32>
    %143 = arith.mulf %111, %129 : vector<8x32xf32>
    %144 = arith.addf %142, %143 : vector<8x32xf32>
    %145 = math.tanh %144 : vector<8x32xf32>
    %146 = arith.mulf %141, %145 : vector<8x32xf32>
    %c2_i32 = arith.constant 2 : i32
    %c8_i32_94 = arith.constant 8 : i32
    %147 = arith.muli %c2_i32, %c8_i32_94 : i32
    %c0_95 = arith.constant 0 : index
    %148 = arith.index_cast %147 : i32 to index
    %c0_96 = arith.constant 0 : index
    %149 = vector.load %arg7[%c0_95, %148, %c0_96] : memref<4x64x32xf32, #tpu.memory_space<vmem>>, vector<1x8x32xf32>
    %150 = vector.shape_cast %149 : vector<1x8x32xf32> to vector<8x32xf32>
    %cst_97 = arith.constant dense<0.000000e+00> : vector<8x32xf32>
    %151 = tpu.matmul %146, %42, %cst_97 {dimension_numbers = #tpu.dot_dimension_numbers<[1], [0], [0], [1], [0, 0, 1, 1], [], []>} : vector<8x32xf32>, vector<32x32xf32>, vector<8x32xf32> -> vector<8x32xf32>
    %152 = arith.addf %150, %151 : vector<8x32xf32>
    %cst_98 = arith.constant 5.000000e-01 : f32
    %153 = vector.broadcast %cst_98 : f32 to vector<8x32xf32>
    %154 = arith.mulf %153, %152 : vector<8x32xf32>
    %155 = math.tanh %154 : vector<8x32xf32>
    %cst_99 = arith.constant 5.000000e-01 : f32
    %156 = vector.broadcast %cst_99 : f32 to vector<8x32xf32>
    %157 = arith.mulf %156, %155 : vector<8x32xf32>
    %cst_100 = arith.constant 5.000000e-01 : f32
    %158 = vector.broadcast %cst_100 : f32 to vector<8x32xf32>
    %159 = arith.addf %157, %158 : vector<8x32xf32>
    %c1_101 = arith.constant 1 : index
    %160 = arith.index_cast %147 : i32 to index
    %c0_102 = arith.constant 0 : index
    %161 = vector.load %arg7[%c1_101, %160, %c0_102] : memref<4x64x32xf32, #tpu.memory_space<vmem>>, vector<1x8x32xf32>
    %162 = vector.shape_cast %161 : vector<1x8x32xf32> to vector<8x32xf32>
    %cst_103 = arith.constant dense<0.000000e+00> : vector<8x32xf32>
    %163 = tpu.matmul %146, %44, %cst_103 {dimension_numbers = #tpu.dot_dimension_numbers<[1], [0], [0], [1], [0, 0, 1, 1], [], []>} : vector<8x32xf32>, vector<32x32xf32>, vector<8x32xf32> -> vector<8x32xf32>
    %164 = arith.addf %162, %163 : vector<8x32xf32>
    %cst_104 = arith.constant 5.000000e-01 : f32
    %165 = vector.broadcast %cst_104 : f32 to vector<8x32xf32>
    %166 = arith.mulf %165, %164 : vector<8x32xf32>
    %167 = math.tanh %166 : vector<8x32xf32>
    %cst_105 = arith.constant 5.000000e-01 : f32
    %168 = vector.broadcast %cst_105 : f32 to vector<8x32xf32>
    %169 = arith.mulf %168, %167 : vector<8x32xf32>
    %cst_106 = arith.constant 5.000000e-01 : f32
    %170 = vector.broadcast %cst_106 : f32 to vector<8x32xf32>
    %171 = arith.addf %169, %170 : vector<8x32xf32>
    %c2_107 = arith.constant 2 : index
    %172 = arith.index_cast %147 : i32 to index
    %c0_108 = arith.constant 0 : index
    %173 = vector.load %arg7[%c2_107, %172, %c0_108] : memref<4x64x32xf32, #tpu.memory_space<vmem>>, vector<1x8x32xf32>
    %174 = vector.shape_cast %173 : vector<1x8x32xf32> to vector<8x32xf32>
    %cst_109 = arith.constant dense<0.000000e+00> : vector<8x32xf32>
    %175 = tpu.matmul %146, %46, %cst_109 {dimension_numbers = #tpu.dot_dimension_numbers<[1], [0], [0], [1], [0, 0, 1, 1], [], []>} : vector<8x32xf32>, vector<32x32xf32>, vector<8x32xf32> -> vector<8x32xf32>
    %176 = arith.addf %174, %175 : vector<8x32xf32>
    %177 = math.tanh %176 : vector<8x32xf32>
    %c3_110 = arith.constant 3 : index
    %178 = arith.index_cast %147 : i32 to index
    %c0_111 = arith.constant 0 : index
    %179 = vector.load %arg7[%c3_110, %178, %c0_111] : memref<4x64x32xf32, #tpu.memory_space<vmem>>, vector<1x8x32xf32>
    %180 = vector.shape_cast %179 : vector<1x8x32xf32> to vector<8x32xf32>
    %cst_112 = arith.constant dense<0.000000e+00> : vector<8x32xf32>
    %181 = tpu.matmul %146, %48, %cst_112 {dimension_numbers = #tpu.dot_dimension_numbers<[1], [0], [0], [1], [0, 0, 1, 1], [], []>} : vector<8x32xf32>, vector<32x32xf32>, vector<8x32xf32> -> vector<8x32xf32>
    %182 = arith.addf %180, %181 : vector<8x32xf32>
    %cst_113 = arith.constant 5.000000e-01 : f32
    %183 = vector.broadcast %cst_113 : f32 to vector<8x32xf32>
    %184 = arith.mulf %183, %182 : vector<8x32xf32>
    %185 = math.tanh %184 : vector<8x32xf32>
    %cst_114 = arith.constant 5.000000e-01 : f32
    %186 = vector.broadcast %cst_114 : f32 to vector<8x32xf32>
    %187 = arith.mulf %186, %185 : vector<8x32xf32>
    %cst_115 = arith.constant 5.000000e-01 : f32
    %188 = vector.broadcast %cst_115 : f32 to vector<8x32xf32>
    %189 = arith.addf %187, %188 : vector<8x32xf32>
    %190 = arith.mulf %171, %144 : vector<8x32xf32>
    %191 = arith.mulf %159, %177 : vector<8x32xf32>
    %192 = arith.addf %190, %191 : vector<8x32xf32>
    %193 = math.tanh %192 : vector<8x32xf32>
    %194 = arith.mulf %189, %193 : vector<8x32xf32>
    %c3_i32 = arith.constant 3 : i32
    %c8_i32_116 = arith.constant 8 : i32
    %195 = arith.muli %c3_i32, %c8_i32_116 : i32
    %c0_117 = arith.constant 0 : index
    %196 = arith.index_cast %195 : i32 to index
    %c0_118 = arith.constant 0 : index
    %197 = vector.load %arg7[%c0_117, %196, %c0_118] : memref<4x64x32xf32, #tpu.memory_space<vmem>>, vector<1x8x32xf32>
    %198 = vector.shape_cast %197 : vector<1x8x32xf32> to vector<8x32xf32>
    %cst_119 = arith.constant dense<0.000000e+00> : vector<8x32xf32>
    %199 = tpu.matmul %194, %42, %cst_119 {dimension_numbers = #tpu.dot_dimension_numbers<[1], [0], [0], [1], [0, 0, 1, 1], [], []>} : vector<8x32xf32>, vector<32x32xf32>, vector<8x32xf32> -> vector<8x32xf32>
    %200 = arith.addf %198, %199 : vector<8x32xf32>
    %cst_120 = arith.constant 5.000000e-01 : f32
    %201 = vector.broadcast %cst_120 : f32 to vector<8x32xf32>
    %202 = arith.mulf %201, %200 : vector<8x32xf32>
    %203 = math.tanh %202 : vector<8x32xf32>
    %cst_121 = arith.constant 5.000000e-01 : f32
    %204 = vector.broadcast %cst_121 : f32 to vector<8x32xf32>
    %205 = arith.mulf %204, %203 : vector<8x32xf32>
    %cst_122 = arith.constant 5.000000e-01 : f32
    %206 = vector.broadcast %cst_122 : f32 to vector<8x32xf32>
    %207 = arith.addf %205, %206 : vector<8x32xf32>
    %c1_123 = arith.constant 1 : index
    %208 = arith.index_cast %195 : i32 to index
    %c0_124 = arith.constant 0 : index
    %209 = vector.load %arg7[%c1_123, %208, %c0_124] : memref<4x64x32xf32, #tpu.memory_space<vmem>>, vector<1x8x32xf32>
    %210 = vector.shape_cast %209 : vector<1x8x32xf32> to vector<8x32xf32>
    %cst_125 = arith.constant dense<0.000000e+00> : vector<8x32xf32>
    %211 = tpu.matmul %194, %44, %cst_125 {dimension_numbers = #tpu.dot_dimension_numbers<[1], [0], [0], [1], [0, 0, 1, 1], [], []>} : vector<8x32xf32>, vector<32x32xf32>, vector<8x32xf32> -> vector<8x32xf32>
    %212 = arith.addf %210, %211 : vector<8x32xf32>
    %cst_126 = arith.constant 5.000000e-01 : f32
    %213 = vector.broadcast %cst_126 : f32 to vector<8x32xf32>
    %214 = arith.mulf %213, %212 : vector<8x32xf32>
    %215 = math.tanh %214 : vector<8x32xf32>
    %cst_127 = arith.constant 5.000000e-01 : f32
    %216 = vector.broadcast %cst_127 : f32 to vector<8x32xf32>
    %217 = arith.mulf %216, %215 : vector<8x32xf32>
    %cst_128 = arith.constant 5.000000e-01 : f32
    %218 = vector.broadcast %cst_128 : f32 to vector<8x32xf32>
    %219 = arith.addf %217, %218 : vector<8x32xf32>
    %c2_129 = arith.constant 2 : index
    %220 = arith.index_cast %195 : i32 to index
    %c0_130 = arith.constant 0 : index
    %221 = vector.load %arg7[%c2_129, %220, %c0_130] : memref<4x64x32xf32, #tpu.memory_space<vmem>>, vector<1x8x32xf32>
    %222 = vector.shape_cast %221 : vector<1x8x32xf32> to vector<8x32xf32>
    %cst_131 = arith.constant dense<0.000000e+00> : vector<8x32xf32>
    %223 = tpu.matmul %194, %46, %cst_131 {dimension_numbers = #tpu.dot_dimension_numbers<[1], [0], [0], [1], [0, 0, 1, 1], [], []>} : vector<8x32xf32>, vector<32x32xf32>, vector<8x32xf32> -> vector<8x32xf32>
    %224 = arith.addf %222, %223 : vector<8x32xf32>
    %225 = math.tanh %224 : vector<8x32xf32>
    %c3_132 = arith.constant 3 : index
    %226 = arith.index_cast %195 : i32 to index
    %c0_133 = arith.constant 0 : index
    %227 = vector.load %arg7[%c3_132, %226, %c0_133] : memref<4x64x32xf32, #tpu.memory_space<vmem>>, vector<1x8x32xf32>
    %228 = vector.shape_cast %227 : vector<1x8x32xf32> to vector<8x32xf32>
    %cst_134 = arith.constant dense<0.000000e+00> : vector<8x32xf32>
    %229 = tpu.matmul %194, %48, %cst_134 {dimension_numbers = #tpu.dot_dimension_numbers<[1], [0], [0], [1], [0, 0, 1, 1], [], []>} : vector<8x32xf32>, vector<32x32xf32>, vector<8x32xf32> -> vector<8x32xf32>
    %230 = arith.addf %228, %229 : vector<8x32xf32>
    %cst_135 = arith.constant 5.000000e-01 : f32
    %231 = vector.broadcast %cst_135 : f32 to vector<8x32xf32>
    %232 = arith.mulf %231, %230 : vector<8x32xf32>
    %233 = math.tanh %232 : vector<8x32xf32>
    %cst_136 = arith.constant 5.000000e-01 : f32
    %234 = vector.broadcast %cst_136 : f32 to vector<8x32xf32>
    %235 = arith.mulf %234, %233 : vector<8x32xf32>
    %cst_137 = arith.constant 5.000000e-01 : f32
    %236 = vector.broadcast %cst_137 : f32 to vector<8x32xf32>
    %237 = arith.addf %235, %236 : vector<8x32xf32>
    %238 = arith.mulf %219, %192 : vector<8x32xf32>
    %239 = arith.mulf %207, %225 : vector<8x32xf32>
    %240 = arith.addf %238, %239 : vector<8x32xf32>
    %241 = math.tanh %240 : vector<8x32xf32>
    %242 = arith.mulf %237, %241 : vector<8x32xf32>
    %c4_i32 = arith.constant 4 : i32
    %c8_i32_138 = arith.constant 8 : i32
    %243 = arith.muli %c4_i32, %c8_i32_138 : i32
    %c0_139 = arith.constant 0 : index
    %244 = arith.index_cast %243 : i32 to index
    %c0_140 = arith.constant 0 : index
    %245 = vector.load %arg7[%c0_139, %244, %c0_140] : memref<4x64x32xf32, #tpu.memory_space<vmem>>, vector<1x8x32xf32>
    %246 = vector.shape_cast %245 : vector<1x8x32xf32> to vector<8x32xf32>
    %cst_141 = arith.constant dense<0.000000e+00> : vector<8x32xf32>
    %247 = tpu.matmul %242, %42, %cst_141 {dimension_numbers = #tpu.dot_dimension_numbers<[1], [0], [0], [1], [0, 0, 1, 1], [], []>} : vector<8x32xf32>, vector<32x32xf32>, vector<8x32xf32> -> vector<8x32xf32>
    %248 = arith.addf %246, %247 : vector<8x32xf32>
    %cst_142 = arith.constant 5.000000e-01 : f32
    %249 = vector.broadcast %cst_142 : f32 to vector<8x32xf32>
    %250 = arith.mulf %249, %248 : vector<8x32xf32>
    %251 = math.tanh %250 : vector<8x32xf32>
    %cst_143 = arith.constant 5.000000e-01 : f32
    %252 = vector.broadcast %cst_143 : f32 to vector<8x32xf32>
    %253 = arith.mulf %252, %251 : vector<8x32xf32>
    %cst_144 = arith.constant 5.000000e-01 : f32
    %254 = vector.broadcast %cst_144 : f32 to vector<8x32xf32>
    %255 = arith.addf %253, %254 : vector<8x32xf32>
    %c1_145 = arith.constant 1 : index
    %256 = arith.index_cast %243 : i32 to index
    %c0_146 = arith.constant 0 : index
    %257 = vector.load %arg7[%c1_145, %256, %c0_146] : memref<4x64x32xf32, #tpu.memory_space<vmem>>, vector<1x8x32xf32>
    %258 = vector.shape_cast %257 : vector<1x8x32xf32> to vector<8x32xf32>
    %cst_147 = arith.constant dense<0.000000e+00> : vector<8x32xf32>
    %259 = tpu.matmul %242, %44, %cst_147 {dimension_numbers = #tpu.dot_dimension_numbers<[1], [0], [0], [1], [0, 0, 1, 1], [], []>} : vector<8x32xf32>, vector<32x32xf32>, vector<8x32xf32> -> vector<8x32xf32>
    %260 = arith.addf %258, %259 : vector<8x32xf32>
    %cst_148 = arith.constant 5.000000e-01 : f32
    %261 = vector.broadcast %cst_148 : f32 to vector<8x32xf32>
    %262 = arith.mulf %261, %260 : vector<8x32xf32>
    %263 = math.tanh %262 : vector<8x32xf32>
    %cst_149 = arith.constant 5.000000e-01 : f32
    %264 = vector.broadcast %cst_149 : f32 to vector<8x32xf32>
    %265 = arith.mulf %264, %263 : vector<8x32xf32>
    %cst_150 = arith.constant 5.000000e-01 : f32
    %266 = vector.broadcast %cst_150 : f32 to vector<8x32xf32>
    %267 = arith.addf %265, %266 : vector<8x32xf32>
    %c2_151 = arith.constant 2 : index
    %268 = arith.index_cast %243 : i32 to index
    %c0_152 = arith.constant 0 : index
    %269 = vector.load %arg7[%c2_151, %268, %c0_152] : memref<4x64x32xf32, #tpu.memory_space<vmem>>, vector<1x8x32xf32>
    %270 = vector.shape_cast %269 : vector<1x8x32xf32> to vector<8x32xf32>
    %cst_153 = arith.constant dense<0.000000e+00> : vector<8x32xf32>
    %271 = tpu.matmul %242, %46, %cst_153 {dimension_numbers = #tpu.dot_dimension_numbers<[1], [0], [0], [1], [0, 0, 1, 1], [], []>} : vector<8x32xf32>, vector<32x32xf32>, vector<8x32xf32> -> vector<8x32xf32>
    %272 = arith.addf %270, %271 : vector<8x32xf32>
    %273 = math.tanh %272 : vector<8x32xf32>
    %c3_154 = arith.constant 3 : index
    %274 = arith.index_cast %243 : i32 to index
    %c0_155 = arith.constant 0 : index
    %275 = vector.load %arg7[%c3_154, %274, %c0_155] : memref<4x64x32xf32, #tpu.memory_space<vmem>>, vector<1x8x32xf32>
    %276 = vector.shape_cast %275 : vector<1x8x32xf32> to vector<8x32xf32>
    %cst_156 = arith.constant dense<0.000000e+00> : vector<8x32xf32>
    %277 = tpu.matmul %242, %48, %cst_156 {dimension_numbers = #tpu.dot_dimension_numbers<[1], [0], [0], [1], [0, 0, 1, 1], [], []>} : vector<8x32xf32>, vector<32x32xf32>, vector<8x32xf32> -> vector<8x32xf32>
    %278 = arith.addf %276, %277 : vector<8x32xf32>
    %cst_157 = arith.constant 5.000000e-01 : f32
    %279 = vector.broadcast %cst_157 : f32 to vector<8x32xf32>
    %280 = arith.mulf %279, %278 : vector<8x32xf32>
    %281 = math.tanh %280 : vector<8x32xf32>
    %cst_158 = arith.constant 5.000000e-01 : f32
    %282 = vector.broadcast %cst_158 : f32 to vector<8x32xf32>
    %283 = arith.mulf %282, %281 : vector<8x32xf32>
    %cst_159 = arith.constant 5.000000e-01 : f32
    %284 = vector.broadcast %cst_159 : f32 to vector<8x32xf32>
    %285 = arith.addf %283, %284 : vector<8x32xf32>
    %286 = arith.mulf %267, %240 : vector<8x32xf32>
    %287 = arith.mulf %255, %273 : vector<8x32xf32>
    %288 = arith.addf %286, %287 : vector<8x32xf32>
    %289 = math.tanh %288 : vector<8x32xf32>
    %290 = arith.mulf %285, %289 : vector<8x32xf32>
    %c5_i32 = arith.constant 5 : i32
    %c8_i32_160 = arith.constant 8 : i32
    %291 = arith.muli %c5_i32, %c8_i32_160 : i32
    %c0_161 = arith.constant 0 : index
    %292 = arith.index_cast %291 : i32 to index
    %c0_162 = arith.constant 0 : index
    %293 = vector.load %arg7[%c0_161, %292, %c0_162] : memref<4x64x32xf32, #tpu.memory_space<vmem>>, vector<1x8x32xf32>
    %294 = vector.shape_cast %293 : vector<1x8x32xf32> to vector<8x32xf32>
    %cst_163 = arith.constant dense<0.000000e+00> : vector<8x32xf32>
    %295 = tpu.matmul %290, %42, %cst_163 {dimension_numbers = #tpu.dot_dimension_numbers<[1], [0], [0], [1], [0, 0, 1, 1], [], []>} : vector<8x32xf32>, vector<32x32xf32>, vector<8x32xf32> -> vector<8x32xf32>
    %296 = arith.addf %294, %295 : vector<8x32xf32>
    %cst_164 = arith.constant 5.000000e-01 : f32
    %297 = vector.broadcast %cst_164 : f32 to vector<8x32xf32>
    %298 = arith.mulf %297, %296 : vector<8x32xf32>
    %299 = math.tanh %298 : vector<8x32xf32>
    %cst_165 = arith.constant 5.000000e-01 : f32
    %300 = vector.broadcast %cst_165 : f32 to vector<8x32xf32>
    %301 = arith.mulf %300, %299 : vector<8x32xf32>
    %cst_166 = arith.constant 5.000000e-01 : f32
    %302 = vector.broadcast %cst_166 : f32 to vector<8x32xf32>
    %303 = arith.addf %301, %302 : vector<8x32xf32>
    %c1_167 = arith.constant 1 : index
    %304 = arith.index_cast %291 : i32 to index
    %c0_168 = arith.constant 0 : index
    %305 = vector.load %arg7[%c1_167, %304, %c0_168] : memref<4x64x32xf32, #tpu.memory_space<vmem>>, vector<1x8x32xf32>
    %306 = vector.shape_cast %305 : vector<1x8x32xf32> to vector<8x32xf32>
    %cst_169 = arith.constant dense<0.000000e+00> : vector<8x32xf32>
    %307 = tpu.matmul %290, %44, %cst_169 {dimension_numbers = #tpu.dot_dimension_numbers<[1], [0], [0], [1], [0, 0, 1, 1], [], []>} : vector<8x32xf32>, vector<32x32xf32>, vector<8x32xf32> -> vector<8x32xf32>
    %308 = arith.addf %306, %307 : vector<8x32xf32>
    %cst_170 = arith.constant 5.000000e-01 : f32
    %309 = vector.broadcast %cst_170 : f32 to vector<8x32xf32>
    %310 = arith.mulf %309, %308 : vector<8x32xf32>
    %311 = math.tanh %310 : vector<8x32xf32>
    %cst_171 = arith.constant 5.000000e-01 : f32
    %312 = vector.broadcast %cst_171 : f32 to vector<8x32xf32>
    %313 = arith.mulf %312, %311 : vector<8x32xf32>
    %cst_172 = arith.constant 5.000000e-01 : f32
    %314 = vector.broadcast %cst_172 : f32 to vector<8x32xf32>
    %315 = arith.addf %313, %314 : vector<8x32xf32>
    %c2_173 = arith.constant 2 : index
    %316 = arith.index_cast %291 : i32 to index
    %c0_174 = arith.constant 0 : index
    %317 = vector.load %arg7[%c2_173, %316, %c0_174] : memref<4x64x32xf32, #tpu.memory_space<vmem>>, vector<1x8x32xf32>
    %318 = vector.shape_cast %317 : vector<1x8x32xf32> to vector<8x32xf32>
    %cst_175 = arith.constant dense<0.000000e+00> : vector<8x32xf32>
    %319 = tpu.matmul %290, %46, %cst_175 {dimension_numbers = #tpu.dot_dimension_numbers<[1], [0], [0], [1], [0, 0, 1, 1], [], []>} : vector<8x32xf32>, vector<32x32xf32>, vector<8x32xf32> -> vector<8x32xf32>
    %320 = arith.addf %318, %319 : vector<8x32xf32>
    %321 = math.tanh %320 : vector<8x32xf32>
    %c3_176 = arith.constant 3 : index
    %322 = arith.index_cast %291 : i32 to index
    %c0_177 = arith.constant 0 : index
    %323 = vector.load %arg7[%c3_176, %322, %c0_177] : memref<4x64x32xf32, #tpu.memory_space<vmem>>, vector<1x8x32xf32>
    %324 = vector.shape_cast %323 : vector<1x8x32xf32> to vector<8x32xf32>
    %cst_178 = arith.constant dense<0.000000e+00> : vector<8x32xf32>
    %325 = tpu.matmul %290, %48, %cst_178 {dimension_numbers = #tpu.dot_dimension_numbers<[1], [0], [0], [1], [0, 0, 1, 1], [], []>} : vector<8x32xf32>, vector<32x32xf32>, vector<8x32xf32> -> vector<8x32xf32>
    %326 = arith.addf %324, %325 : vector<8x32xf32>
    %cst_179 = arith.constant 5.000000e-01 : f32
    %327 = vector.broadcast %cst_179 : f32 to vector<8x32xf32>
    %328 = arith.mulf %327, %326 : vector<8x32xf32>
    %329 = math.tanh %328 : vector<8x32xf32>
    %cst_180 = arith.constant 5.000000e-01 : f32
    %330 = vector.broadcast %cst_180 : f32 to vector<8x32xf32>
    %331 = arith.mulf %330, %329 : vector<8x32xf32>
    %cst_181 = arith.constant 5.000000e-01 : f32
    %332 = vector.broadcast %cst_181 : f32 to vector<8x32xf32>
    %333 = arith.addf %331, %332 : vector<8x32xf32>
    %334 = arith.mulf %315, %288 : vector<8x32xf32>
    %335 = arith.mulf %303, %321 : vector<8x32xf32>
    %336 = arith.addf %334, %335 : vector<8x32xf32>
    %337 = math.tanh %336 : vector<8x32xf32>
    %338 = arith.mulf %333, %337 : vector<8x32xf32>
    %c6_i32 = arith.constant 6 : i32
    %c8_i32_182 = arith.constant 8 : i32
    %339 = arith.muli %c6_i32, %c8_i32_182 : i32
    %c0_183 = arith.constant 0 : index
    %340 = arith.index_cast %339 : i32 to index
    %c0_184 = arith.constant 0 : index
    %341 = vector.load %arg7[%c0_183, %340, %c0_184] : memref<4x64x32xf32, #tpu.memory_space<vmem>>, vector<1x8x32xf32>
    %342 = vector.shape_cast %341 : vector<1x8x32xf32> to vector<8x32xf32>
    %cst_185 = arith.constant dense<0.000000e+00> : vector<8x32xf32>
    %343 = tpu.matmul %338, %42, %cst_185 {dimension_numbers = #tpu.dot_dimension_numbers<[1], [0], [0], [1], [0, 0, 1, 1], [], []>} : vector<8x32xf32>, vector<32x32xf32>, vector<8x32xf32> -> vector<8x32xf32>
    %344 = arith.addf %342, %343 : vector<8x32xf32>
    %cst_186 = arith.constant 5.000000e-01 : f32
    %345 = vector.broadcast %cst_186 : f32 to vector<8x32xf32>
    %346 = arith.mulf %345, %344 : vector<8x32xf32>
    %347 = math.tanh %346 : vector<8x32xf32>
    %cst_187 = arith.constant 5.000000e-01 : f32
    %348 = vector.broadcast %cst_187 : f32 to vector<8x32xf32>
    %349 = arith.mulf %348, %347 : vector<8x32xf32>
    %cst_188 = arith.constant 5.000000e-01 : f32
    %350 = vector.broadcast %cst_188 : f32 to vector<8x32xf32>
    %351 = arith.addf %349, %350 : vector<8x32xf32>
    %c1_189 = arith.constant 1 : index
    %352 = arith.index_cast %339 : i32 to index
    %c0_190 = arith.constant 0 : index
    %353 = vector.load %arg7[%c1_189, %352, %c0_190] : memref<4x64x32xf32, #tpu.memory_space<vmem>>, vector<1x8x32xf32>
    %354 = vector.shape_cast %353 : vector<1x8x32xf32> to vector<8x32xf32>
    %cst_191 = arith.constant dense<0.000000e+00> : vector<8x32xf32>
    %355 = tpu.matmul %338, %44, %cst_191 {dimension_numbers = #tpu.dot_dimension_numbers<[1], [0], [0], [1], [0, 0, 1, 1], [], []>} : vector<8x32xf32>, vector<32x32xf32>, vector<8x32xf32> -> vector<8x32xf32>
    %356 = arith.addf %354, %355 : vector<8x32xf32>
    %cst_192 = arith.constant 5.000000e-01 : f32
    %357 = vector.broadcast %cst_192 : f32 to vector<8x32xf32>
    %358 = arith.mulf %357, %356 : vector<8x32xf32>
    %359 = math.tanh %358 : vector<8x32xf32>
    %cst_193 = arith.constant 5.000000e-01 : f32
    %360 = vector.broadcast %cst_193 : f32 to vector<8x32xf32>
    %361 = arith.mulf %360, %359 : vector<8x32xf32>
    %cst_194 = arith.constant 5.000000e-01 : f32
    %362 = vector.broadcast %cst_194 : f32 to vector<8x32xf32>
    %363 = arith.addf %361, %362 : vector<8x32xf32>
    %c2_195 = arith.constant 2 : index
    %364 = arith.index_cast %339 : i32 to index
    %c0_196 = arith.constant 0 : index
    %365 = vector.load %arg7[%c2_195, %364, %c0_196] : memref<4x64x32xf32, #tpu.memory_space<vmem>>, vector<1x8x32xf32>
    %366 = vector.shape_cast %365 : vector<1x8x32xf32> to vector<8x32xf32>
    %cst_197 = arith.constant dense<0.000000e+00> : vector<8x32xf32>
    %367 = tpu.matmul %338, %46, %cst_197 {dimension_numbers = #tpu.dot_dimension_numbers<[1], [0], [0], [1], [0, 0, 1, 1], [], []>} : vector<8x32xf32>, vector<32x32xf32>, vector<8x32xf32> -> vector<8x32xf32>
    %368 = arith.addf %366, %367 : vector<8x32xf32>
    %369 = math.tanh %368 : vector<8x32xf32>
    %c3_198 = arith.constant 3 : index
    %370 = arith.index_cast %339 : i32 to index
    %c0_199 = arith.constant 0 : index
    %371 = vector.load %arg7[%c3_198, %370, %c0_199] : memref<4x64x32xf32, #tpu.memory_space<vmem>>, vector<1x8x32xf32>
    %372 = vector.shape_cast %371 : vector<1x8x32xf32> to vector<8x32xf32>
    %cst_200 = arith.constant dense<0.000000e+00> : vector<8x32xf32>
    %373 = tpu.matmul %338, %48, %cst_200 {dimension_numbers = #tpu.dot_dimension_numbers<[1], [0], [0], [1], [0, 0, 1, 1], [], []>} : vector<8x32xf32>, vector<32x32xf32>, vector<8x32xf32> -> vector<8x32xf32>
    %374 = arith.addf %372, %373 : vector<8x32xf32>
    %cst_201 = arith.constant 5.000000e-01 : f32
    %375 = vector.broadcast %cst_201 : f32 to vector<8x32xf32>
    %376 = arith.mulf %375, %374 : vector<8x32xf32>
    %377 = math.tanh %376 : vector<8x32xf32>
    %cst_202 = arith.constant 5.000000e-01 : f32
    %378 = vector.broadcast %cst_202 : f32 to vector<8x32xf32>
    %379 = arith.mulf %378, %377 : vector<8x32xf32>
    %cst_203 = arith.constant 5.000000e-01 : f32
    %380 = vector.broadcast %cst_203 : f32 to vector<8x32xf32>
    %381 = arith.addf %379, %380 : vector<8x32xf32>
    %382 = arith.mulf %363, %336 : vector<8x32xf32>
    %383 = arith.mulf %351, %369 : vector<8x32xf32>
    %384 = arith.addf %382, %383 : vector<8x32xf32>
    %385 = math.tanh %384 : vector<8x32xf32>
    %386 = arith.mulf %381, %385 : vector<8x32xf32>
    %c7_i32 = arith.constant 7 : i32
    %c8_i32_204 = arith.constant 8 : i32
    %387 = arith.muli %c7_i32, %c8_i32_204 : i32
    %c0_205 = arith.constant 0 : index
    %388 = arith.index_cast %387 : i32 to index
    %c0_206 = arith.constant 0 : index
    %389 = vector.load %arg7[%c0_205, %388, %c0_206] : memref<4x64x32xf32, #tpu.memory_space<vmem>>, vector<1x8x32xf32>
    %390 = vector.shape_cast %389 : vector<1x8x32xf32> to vector<8x32xf32>
    %cst_207 = arith.constant dense<0.000000e+00> : vector<8x32xf32>
    %391 = tpu.matmul %386, %42, %cst_207 {dimension_numbers = #tpu.dot_dimension_numbers<[1], [0], [0], [1], [0, 0, 1, 1], [], []>} : vector<8x32xf32>, vector<32x32xf32>, vector<8x32xf32> -> vector<8x32xf32>
    %392 = arith.addf %390, %391 : vector<8x32xf32>
    %cst_208 = arith.constant 5.000000e-01 : f32
    %393 = vector.broadcast %cst_208 : f32 to vector<8x32xf32>
    %394 = arith.mulf %393, %392 : vector<8x32xf32>
    %395 = math.tanh %394 : vector<8x32xf32>
    %cst_209 = arith.constant 5.000000e-01 : f32
    %396 = vector.broadcast %cst_209 : f32 to vector<8x32xf32>
    %397 = arith.mulf %396, %395 : vector<8x32xf32>
    %cst_210 = arith.constant 5.000000e-01 : f32
    %398 = vector.broadcast %cst_210 : f32 to vector<8x32xf32>
    %399 = arith.addf %397, %398 : vector<8x32xf32>
    %c1_211 = arith.constant 1 : index
    %400 = arith.index_cast %387 : i32 to index
    %c0_212 = arith.constant 0 : index
    %401 = vector.load %arg7[%c1_211, %400, %c0_212] : memref<4x64x32xf32, #tpu.memory_space<vmem>>, vector<1x8x32xf32>
    %402 = vector.shape_cast %401 : vector<1x8x32xf32> to vector<8x32xf32>
    %cst_213 = arith.constant dense<0.000000e+00> : vector<8x32xf32>
    %403 = tpu.matmul %386, %44, %cst_213 {dimension_numbers = #tpu.dot_dimension_numbers<[1], [0], [0], [1], [0, 0, 1, 1], [], []>} : vector<8x32xf32>, vector<32x32xf32>, vector<8x32xf32> -> vector<8x32xf32>
    %404 = arith.addf %402, %403 : vector<8x32xf32>
    %cst_214 = arith.constant 5.000000e-01 : f32
    %405 = vector.broadcast %cst_214 : f32 to vector<8x32xf32>
    %406 = arith.mulf %405, %404 : vector<8x32xf32>
    %407 = math.tanh %406 : vector<8x32xf32>
    %cst_215 = arith.constant 5.000000e-01 : f32
    %408 = vector.broadcast %cst_215 : f32 to vector<8x32xf32>
    %409 = arith.mulf %408, %407 : vector<8x32xf32>
    %cst_216 = arith.constant 5.000000e-01 : f32
    %410 = vector.broadcast %cst_216 : f32 to vector<8x32xf32>
    %411 = arith.addf %409, %410 : vector<8x32xf32>
    %c2_217 = arith.constant 2 : index
    %412 = arith.index_cast %387 : i32 to index
    %c0_218 = arith.constant 0 : index
    %413 = vector.load %arg7[%c2_217, %412, %c0_218] : memref<4x64x32xf32, #tpu.memory_space<vmem>>, vector<1x8x32xf32>
    %414 = vector.shape_cast %413 : vector<1x8x32xf32> to vector<8x32xf32>
    %cst_219 = arith.constant dense<0.000000e+00> : vector<8x32xf32>
    %415 = tpu.matmul %386, %46, %cst_219 {dimension_numbers = #tpu.dot_dimension_numbers<[1], [0], [0], [1], [0, 0, 1, 1], [], []>} : vector<8x32xf32>, vector<32x32xf32>, vector<8x32xf32> -> vector<8x32xf32>
    %416 = arith.addf %414, %415 : vector<8x32xf32>
    %417 = math.tanh %416 : vector<8x32xf32>
    %c3_220 = arith.constant 3 : index
    %418 = arith.index_cast %387 : i32 to index
    %c0_221 = arith.constant 0 : index
    %419 = vector.load %arg7[%c3_220, %418, %c0_221] : memref<4x64x32xf32, #tpu.memory_space<vmem>>, vector<1x8x32xf32>
    %420 = vector.shape_cast %419 : vector<1x8x32xf32> to vector<8x32xf32>
    %cst_222 = arith.constant dense<0.000000e+00> : vector<8x32xf32>
    %421 = tpu.matmul %386, %48, %cst_222 {dimension_numbers = #tpu.dot_dimension_numbers<[1], [0], [0], [1], [0, 0, 1, 1], [], []>} : vector<8x32xf32>, vector<32x32xf32>, vector<8x32xf32> -> vector<8x32xf32>
    %422 = arith.addf %420, %421 : vector<8x32xf32>
    %cst_223 = arith.constant 5.000000e-01 : f32
    %423 = vector.broadcast %cst_223 : f32 to vector<8x32xf32>
    %424 = arith.mulf %423, %422 : vector<8x32xf32>
    %425 = math.tanh %424 : vector<8x32xf32>
    %cst_224 = arith.constant 5.000000e-01 : f32
    %426 = vector.broadcast %cst_224 : f32 to vector<8x32xf32>
    %427 = arith.mulf %426, %425 : vector<8x32xf32>
    %cst_225 = arith.constant 5.000000e-01 : f32
    %428 = vector.broadcast %cst_225 : f32 to vector<8x32xf32>
    %429 = arith.addf %427, %428 : vector<8x32xf32>
    %430 = arith.mulf %411, %384 : vector<8x32xf32>
    %431 = arith.mulf %399, %417 : vector<8x32xf32>
    %432 = arith.addf %430, %431 : vector<8x32xf32>
    %433 = math.tanh %432 : vector<8x32xf32>
    %434 = arith.mulf %429, %433 : vector<8x32xf32>
    %c8_i32_226 = arith.constant 8 : i32
    %c0_227 = arith.constant 0 : index
    %c0_228 = arith.constant 0 : index
    %435 = vector.load %arg4[%c0_227, %c0_228] : memref<32x128xf32, #tpu.memory_space<vmem>>, vector<32x128xf32>
    %cst_229 = arith.constant dense<0.000000e+00> : vector<8x128xf32>
    %436 = tpu.matmul %434, %435, %cst_229 {dimension_numbers = #tpu.dot_dimension_numbers<[1], [0], [0], [1], [0, 0, 1, 1], [], []>} : vector<8x32xf32>, vector<32x128xf32>, vector<8x128xf32> -> vector<8x128xf32>
    %c0_230 = arith.constant 0 : index
    %c0_231 = arith.constant 0 : index
    %437 = vector.load %arg5[%c0_230, %c0_231] : memref<1x128xf32, #tpu.memory_space<vmem>>, vector<1x128xf32>
    %438 = vector.broadcast %437 : vector<1x128xf32> to vector<8x128xf32>
    %439 = arith.addf %436, %438 : vector<8x128xf32>
    %cst_232 = arith.constant dense<0xFF800000> : vector<8xf32>
    %440 = vector.multi_reduction <maximumf>, %439, %cst_232 [1] : vector<8x128xf32> to vector<8xf32>
    %441 = vector.shape_cast %440 : vector<8xf32> to vector<8x1xf32>
    %442 = vector.broadcast %441 : vector<8x1xf32> to vector<8x128xf32>
    %443 = arith.subf %439, %442 : vector<8x128xf32>
    %444 = math.exp %443 : vector<8x128xf32>
    %cst_233 = arith.constant dense<0.000000e+00> : vector<8xf32>
    %445 = vector.multi_reduction <add>, %444, %cst_233 [1] : vector<8x128xf32> to vector<8xf32>
    %446 = vector.shape_cast %445 : vector<8xf32> to vector<8x1xf32>
    %447 = tpu.reciprocal %446 : vector<8x1xf32> -> vector<8x1xf32>
    %448 = vector.broadcast %447 : vector<8x1xf32> to vector<8x128xf32>
    %449 = arith.mulf %444, %448 : vector<8x128xf32>
    %c0_234 = arith.constant 0 : index
    %c0_235 = arith.constant 0 : index
    %450 = vector.load %arg6[%c0_234, %c0_235] : memref<8x128xf32, #tpu.memory_space<vmem>>, vector<8x128xf32>
    tpu.vector_store %arg6[%c0_234, %c0_235], %449 {strides = array<i32>} : memref<8x128xf32, #tpu.memory_space<vmem>>, vector<8x128xf32>,
    return
  }
}

</mosaic_0001>

<bundles_post_ra>
// kernel: news_lstm_forward.1
= control target key start
LH: loop header
LB: loop body
LE: loop exit
PB: predicated region body
PF: predicated region fallthrough
CT: control target
= control target key end

     0   :  { %vm40_vm0 = vcmask 130048   ;;  %v4165_v20 = vmov 0.0|0.0   ;;  %vm4166_vm1 = vmmov 0   ;;  %v4167_v35 = vmov 0.0   ;;  %s4656_s1 = inlined_call_operand.vmem [shape: f32[4,16,32], index: 1, kind: input, shape index: {}]   ;;  %s4657_s0 = inlined_call_operand.vmem [shape: f32[64,16], index: 0, kind: input, shape index: {}]   ;;  %s4658_s2 = inlined_call_operand.vmem [shape: f32[4,32,32], index: 2, kind: input, shape index: {}]   ;;  %s4659_s3 = inlined_call_operand.vmem [shape: f32[4,1,32], index: 3, kind: input, shape index: {}]   ;;  %s4660_s4 = inlined_call_operand.vmem [shape: f32[32,128], index: 4, kind: input, shape index: {}]   ;;  %s4661_s5 = inlined_call_operand.vmem [shape: f32[1,128], index: 5, kind: input, shape index: {}]   ;;  %s4662_s6 = inlined_call_operand.vmem [shape: f32[8,128], index: 6, kind: output, shape index: {}]  }
   0x1   :  { %v31_v0 = vld [vmem:[%s4656_s1] sm:$0xff]  ;;  %v32_v1 = vld [vmem:[%s4656_s1 + $0x8] sm:$0xff]  ;;  %v4219_v4 = vld [vmem:[%s4657_s0 + $0x30] sm:$0xff]  ;;  %vm170_vm2 = vcmask 261120  }
   0x2   :  { %v4212_v2 = vld [vmem:[%s4657_s0] sm:$0xff]  ;;  %v3862_v3 = vpack.c.bf16 %v32_v1, %v31_v0  ;;  %3448 = vmatprep.mubr.msk.f32.mxu1 %vm40_vm0, %v4219_v4  ;;  %v3152_v5 = vld [vmem:[%s4656_s1 + $0x10] sm:$0xff]  ;;  %v3153_v6 = vld [vmem:[%s4656_s1 + $0x18] sm:$0xff] }
   0x3   :  { %3439 = vmatprep.mubr.msk.f32.mxu0 %vm40_vm0, %v4212_v2  ;;  %v24_v7 = vld [vmem:[%s4657_s0 + $0x8] sm:$0xff]  ;;  %v3866_v8 = vpack.c.bf16 %v3153_v6, %v3152_v5  ;;  %v3176_v9 = vld [vmem:[%s4656_s1 + $0x30] sm:$0xff]  ;;  %v3177_v10 = vld [vmem:[%s4656_s1 + $0x38] sm:$0xff] }
   0x4   :  { %3863 = vmatprep.subr.bf16.mxu0 %v3862_v3  ;;  %4076 = vmatprep.subr.bf16.mxu1 %v3862_v3  ;;  %v4241_v11 = vld [vmem:[%s4657_s0 + $0x38] sm:$0xff]  ;;  %v3164_v12 = vld [vmem:[%s4656_s1 + $0x20] sm:$0xff]  ;;  %v3165_v13 = vld [vmem:[%s4656_s1 + $0x28] sm:$0xff]  ;;  %v3874_v15 = vpack.c.bf16 %v3177_v10, %v3176_v9 }
   0x5   :  { %3865 = vmatpush3.bf16.msra.mxu0 %v3862_v3  ;;  %4077 = vmatpush3.bf16.msra.mxu1 %v3862_v3  ;;  %v25_v14 = vld [vmem:[%s4657_s0 + $0x10] sm:$0xff]  ;;  %v3870_v16 = vpack.c.bf16 %v3165_v13, %v3164_v12  ;;  %v26_v17 = vld [vmem:[%s4657_s0 + $0x18] sm:$0xff]  ;;  %v27_v18 = vld [vmem:[%s4657_s0 + $0x20] sm:$0xff] }
   0x6   :  { %3867 = vmatprep.subr.bf16.mxu1 %v3866_v8  ;;  %v28_v19 = vld [vmem:[%s4657_s0 + $0x28] sm:$0xff]  ;;  %v554_v21 = vld [vmem:[%s4658_s2] sm:$0xff]  ;;  %v556_v24 = vld [vmem:[%s4658_s2 + $0x10] sm:$0xff] }
   0x7   :  { %3871 = vmatprep.subr.bf16.mxu0 %v3870_v16  ;;  %v555_v22 = vld [vmem:[%s4658_s2 + $0x8] sm:$0xff]  ;;  %v557_v25 = vld [vmem:[%s4658_s2 + $0x18] sm:$0xff]  ;;  %v3188_v26 = vld [vmem:[%s4658_s2 + $0x20] sm:$0xff] }
   0x8   :  { %3440 = vmatmul.mubr.msk.f32.vlgmr.msra.gmra.mrb[0].mxu0 %vm40_vm0, %v24_v7  ;;  %3449 = vmatmul.mubr.msk.f32.vlgmr.msra.gmra.mrb[0].mxu1 %vm40_vm0, %v4241_v11  ;;  %v4284_v23 = vpack.c.bf16 %v555_v22, %v554_v21  ;;  %v3189_v27 = vld [vmem:[%s4658_s2 + $0x28] sm:$0xff]  ;;  %v4304_v28 = vpack.c.bf16 %v557_v25, %v556_v24  ;;  %v3190_v30 = vld [vmem:[%s4658_s2 + $0x30] sm:$0xff]  ;;  %v3191_v31 = vld [vmem:[%s4658_s2 + $0x38] sm:$0xff] }
   0x9   :  { %3869 = vmatpush3.bf16.msra.mxu1 %v3866_v8  ;;  %3442 = vmatprep.mubr.msk.f32.mxu0 %vm40_vm0, %v25_v14  ;;  %v4313_v29 = vpack.c.bf16 %v3189_v27, %v3188_v26  ;;  %v3192_v32 = vld [vmem:[%s4658_s2 + $0x40] sm:$0xff]  ;;  %v3193_v33 = vld [vmem:[%s4658_s2 + $0x48] sm:$0xff]  ;;  %v4336_v34 = vpack.c.bf16 %v3191_v31, %v3190_v30  ;;  %v3194_v37 = vld [vmem:[%s4658_s2 + $0x50] sm:$0xff] }
   0xa   :  { %3455 = vmatprep.mubr.msk.f32.mxu1 %vm40_vm0, %v4212_v2  ;;  %3875 = vmatprep.subr.bf16.mxu1 %v3874_v15  ;;  %v4344_v36 = vpack.c.bf16 %v3193_v33, %v3192_v32  ;;  %v3195_v38 = vld [vmem:[%s4658_s2 + $0x58] sm:$0xff]  ;;  %v3196_v40 = vld [vmem:[%s4658_s2 + $0x60] sm:$0xff]  ;;  %v3197_v41 = vld [vmem:[%s4658_s2 + $0x68] sm:$0xff] }
   0xb   :  { %3873 = vmatpush3.bf16.msra.mxu0 %v3870_v16  ;;  %v4359_v39 = vpack.c.bf16 %v3195_v38, %v3194_v37  ;;  %v4375_v42 = vpack.c.bf16 %v3197_v41, %v3196_v40  ;;  %v3198_v43 = vld [vmem:[%s4658_s2 + $0x70] sm:$0xff]  ;;  %v3199_v44 = vld [vmem:[%s4658_s2 + $0x78] sm:$0xff]  ;;  %v3143_v46 = vld [vmem:[%s4659_s3] ss:$0 sm:$0xff] }
   0xc   :  { %3443 = vmatmul.mubr.msk.f32.gmra.mrb[2].mxu0 %vm40_vm0, %v26_v17  ;;  %3456 = vmatmul.mubr.msk.f32.vlgmr.msra.gmra.mrb[2].mxu1 %vm40_vm0, %v24_v7  ;;  %v4387_v45 = vpack.c.bf16 %v3199_v44, %v3198_v43  ;;  %v3155_v54 = vld [vmem:[%s4659_s3 + $0x1] ss:$0 sm:$0xff]  ;;  %v3167_v8 = vld [vmem:[%s4659_s3 + $0x2] ss:$0 sm:$0xff]  ;;  %v3179_v26 = vld [vmem:[%s4659_s3 + $0x3] ss:$0 sm:$0xff] }
   0xd   :  { %3877 = vmatpush3.bf16.msra.mxu1 %v3874_v15  ;;  %3445 = vmatprep.mubr.msk.f32.mxu0 %vm40_vm0, %v27_v18 }
   0xe   :  { %3458 = vmatprep.mubr.msk.f32.mxu1 %vm40_vm0, %v25_v14  ;;  %3878 = vmatprep.subr.bf16.mxu0 %v4165_v20 }
   0xf   :  { %3884 = vmatprep.subr.bf16.mxu1 %v4165_v20 }
  0x10   :  { %3446 = vmatmul.mubr.msk.f32.gmra.mrb[4].mxu0 %vm40_vm0, %v28_v19  ;;  %3459 = vmatmul.mubr.msk.f32.gmra.mrb[4].mxu1 %vm40_vm0, %v26_v17 }
  0x11   :  { %3461 = vmatprep.mubr.msk.f32.mxu1 %vm40_vm0, %v27_v18  ;;  %3471 = vmatprep.mubr.msk.f32.mxu0 %vm40_vm0, %v4212_v2 }
  0x14   :  { %3462 = vmatmul.mubr.msk.f32.gmra.mrb[6].mxu1 %vm40_vm0, %v28_v19  ;;  %3472 = vmatmul.mubr.msk.f32.vlgmr.msra.gmra.mrb[6].mxu0 %vm40_vm0, %v24_v7 }
  0x15   :  { %3464 = vmatprep.mubr.msk.f32.mxu1 %vm40_vm0, %v4219_v4  ;;  %3474 = vmatprep.mubr.msk.f32.mxu0 %vm40_vm0, %v25_v14 }
  0x16   :  { %3880 = vmatpush3.bf16.msra.mxu0 %v4284_v23 }
  0x17   :  { %3881 = vmatprep.subr.bf16.mxu0 %v4165_v20 }
  0x18   :  { %3465 = vmatmul.mubr.msk.f32.gmra.mrb[8].mxu1 %vm40_vm0, %v4241_v11  ;;  %3475 = vmatmul.mubr.msk.f32.gmra.mrb[8].mxu0 %vm40_vm0, %v26_v17 }
  0x19   :  { %3477 = vmatprep.mubr.msk.f32.mxu0 %vm40_vm0, %v27_v18  ;;  %3487 = vmatprep.mubr.msk.f32.mxu1 %vm40_vm0, %v4212_v2 }
  0x1a   :  { %3883 = vmatpush3.bf16.msra.mxu0 %v4304_v28 }
  0x1b   :  { %3890 = vmatprep.subr.bf16.mxu0 %v4165_v20 }
  0x1c   :  { %3478 = vmatmul.mubr.msk.f32.gmra.mrb[10].mxu0 %vm40_vm0, %v28_v19  ;;  %3488 = vmatmul.mubr.msk.f32.vlgmr.msra.gmra.mrb[10].mxu1 %vm40_vm0, %v24_v7 }
  0x1d   :  { %3886 = vmatpush3.bf16.msra.mxu1 %v4313_v29  ;;  %3480 = vmatprep.mubr.msk.f32.mxu0 %vm40_vm0, %v4219_v4 }
  0x1e   :  { %3490 = vmatprep.mubr.msk.f32.mxu1 %vm40_vm0, %v25_v14  ;;  %3887 = vmatprep.subr.bf16.mxu1 %v4165_v20 }
  0x20   :  { %3481 = vmatmul.mubr.msk.f32.gmra.mrb[12].mxu0 %vm40_vm0, %v4241_v11  ;;  %3491 = vmatmul.mubr.msk.f32.gmra.mrb[12].mxu1 %vm40_vm0, %v26_v17 }
  0x21   :  { %3493 = vmatprep.mubr.msk.f32.mxu1 %vm40_vm0, %v27_v18  ;;  %3507 = vmatprep.mubr.msk.f32.mxu0 %vm4166_vm1, %v4167_v35 }
  0x22   :  { %3889 = vmatpush3.bf16.msra.mxu1 %v4336_v34 }
  0x23   :  { %3896 = vmatprep.subr.bf16.mxu1 %v4165_v20 }
  0x24   :  { %3494 = vmatmul.mubr.msk.f32.gmra.mrb[14].mxu1 %vm40_vm0, %v28_v19  ;;  %3508 = vmatmul.mubr.f32.vlgmr.msra.gmra.mrb[14].mxu0 %v4167_v35 }
  0x25   :  { %3892 = vmatpush3.bf16.msra.mxu0 %v4344_v36  ;;  %3496 = vmatprep.mubr.msk.f32.mxu1 %vm40_vm0, %v4219_v4 }
  0x26   :  { %3893 = vmatprep.subr.bf16.mxu0 %v4165_v20  ;;  %3529 = vmatprep.mubr.msk.f32.mxu0 %vm4166_vm1, %v4167_v35 }
  0x28   :  { %3497 = vmatmul.mubr.msk.f32.gmra.mrb[16].mxu1 %vm40_vm0, %v4241_v11 }
  0x29   :  { %3895 = vmatpush3.bf16.msra.mxu0 %v4359_v39  ;;  %3518 = vmatprep.mubr.msk.f32.mxu1 %vm4166_vm1, %v4167_v35 }
  0x2a   :  { %3902 = vmatprep.subr.bf16.mxu0 %v4165_v20 }
  0x2c   :  { %3530 = vmatmul.mubr.f32.vlgmr.msra.gmra.mrb[16].mxu0 %v4167_v35  ;;  %3519 = vmatmul.mubr.f32.vlgmr.msra.gmra.mrb[18].mxu1 %v4167_v35 }
  0x2d   :  { %3898 = vmatpush3.bf16.msra.mxu1 %v4375_v42  ;;  %3540 = vmatprep.mubr.msk.f32.mxu1 %vm4166_vm1, %v4167_v35 }
  0x2e   :  { %3899 = vmatprep.subr.bf16.mxu1 %v4165_v20  ;;  %3904 = vmatpush3.bf16.msra.mxu0 %v4284_v23 }
  0x2f   :  { %3905 = vmatprep.subr.bf16.mxu0 %v4165_v20  ;;  %3551 = vmatprep.mubr.msk.f32.mxu0 %vm4166_vm1, %v4167_v35 }
  0x31   :  { %3901 = vmatpush3.bf16.msra.mxu1 %v4387_v45 }
  0x32   :  { %3908 = vmatprep.subr.bf16.mxu1 %v4165_v20  ;;  %3907 = vmatpush3.bf16.msra.mxu0 %v4304_v28 }
  0x33   :  { %3914 = vmatprep.subr.bf16.mxu0 %v4165_v20 }
  0x34   :  { %3541 = vmatmul.mubr.f32.vlgmr.msra.gmra.mrb[20].mxu1 %v4167_v35 }
  0x35   :  { %3910 = vmatpush3.bf16.msra.mxu1 %v4313_v29  ;;  %3562 = vmatprep.mubr.msk.f32.mxu1 %vm4166_vm1, %v4167_v35 }
  0x36   :  { %3911 = vmatprep.subr.bf16.mxu1 %v4165_v20 }
  0x39   :  { %3913 = vmatpush3.bf16.msra.mxu1 %v4336_v34 }
  0x3a   :  { %3920 = vmatprep.subr.bf16.mxu1 %v4165_v20 }
  0xdb   :  { %v3450_v47 = vpop.f32.mrb[0].mxu1  ;;  %v3441_v48 = vpop.f32.mrb[0].mxu0 }
  0xdc   :  { %v167_v49 = vadd.f32 %v3450_v47, %v3143_v46  ;;  %v161_v50 = vpop.f32.mrb[1].mxu1  ;;  %v137_v51 = vadd.f32 %v3441_v48, %v3143_v46  ;;  %v131_v52 = vpop.f32.mrb[1].mxu0 }
  0xdd   :  { %v162_v53 = vadd.f32 %v3143_v46, %v161_v50  ;;  %v132_v55 = vadd.f32 %v3143_v46, %v131_v52 }
  0xde   :  { %178 = vst.msk [vmem:[#allocation2 + $0x38] sm:$0xff] %vm170_vm2, %v167_v49  ;;  %172 = vst.msk [vmem:[#allocation2 + $0x8] sm:$0xff] %vm170_vm2, %v137_v51 }
  0xdf   :  { %177 = vst.msk [vmem:[#allocation2 + $0x30] sm:$0xff] %vm170_vm2, %v162_v53  ;;  %v3457_v56 = vpop.f32.mrb[2].mxu1  ;;  %171 = vst.msk [vmem:[#allocation2] sm:$0xff] %vm170_vm2, %v132_v55  ;;  %v3444_v57 = vpop.f32.mrb[2].mxu0 }
  0xe0   :  { %v262_v58 = vadd.f32 %v3457_v56, %v3155_v54  ;;  %v256_v59 = vpop.f32.mrb[3].mxu1  ;;  %v147_v60 = vadd.f32 %v3444_v57, %v3143_v46  ;;  %v141_v61 = vpop.f32.mrb[3].mxu0 }
  0xe1   :  { %v257_v62 = vadd.f32 %v3155_v54, %v256_v59  ;;  %v142_v63 = vadd.f32 %v3143_v46, %v141_v61 }
  0xe2   :  { %297 = vst.msk [vmem:[#allocation2 + $0x48] sm:$0xff] %vm170_vm2, %v262_v58  ;;  %174 = vst.msk [vmem:[#allocation2 + $0x18] sm:$0xff] %vm170_vm2, %v147_v60 }
  0xe3   :  { %296 = vst.msk [vmem:[#allocation2 + $0x40] sm:$0xff] %vm170_vm2, %v257_v62  ;;  %v3460_v0 = vpop.f32.mrb[4].mxu1  ;;  %173 = vst.msk [vmem:[#allocation2 + $0x10] sm:$0xff] %vm170_vm2, %v142_v63  ;;  %v3447_v1 = vpop.f32.mrb[4].mxu0 }
  0xe4   :  { %v272_v2 = vadd.f32 %v3460_v0, %v3155_v54  ;;  %v266_v3 = vpop.f32.mrb[5].mxu1  ;;  %v157_v4 = vadd.f32 %v3447_v1, %v3143_v46  ;;  %v151_v5 = vpop.f32.mrb[5].mxu0 }
  0xe5   :  { %v267_v6 = vadd.f32 %v3155_v54, %v266_v3  ;;  %v152_v7 = vadd.f32 %v3143_v46, %v151_v5 }
  0xe6   :  { %299 = vst.msk [vmem:[#allocation2 + $0x58] sm:$0xff] %vm170_vm2, %v272_v2  ;;  %176 = vst.msk [vmem:[#allocation2 + $0x28] sm:$0xff] %vm170_vm2, %v157_v4  ;;  %v573_v53 = vld [vmem:[#allocation2] sm:$0xff] }
  0xe7   :  { %298 = vst.msk [vmem:[#allocation2 + $0x50] sm:$0xff] %vm170_vm2, %v267_v6  ;;  %v3463_v9 = vpop.f32.mrb[6].mxu1  ;;  %175 = vst.msk [vmem:[#allocation2 + $0x20] sm:$0xff] %vm170_vm2, %v152_v7  ;;  %v3473_v10 = vpop.f32.mrb[6].mxu0 }
  0xe8   :  { %v282_v11 = vadd.f32 %v3463_v9, %v3155_v54  ;;  %v276_v12 = vpop.f32.mrb[7].mxu1  ;;  %v387_v13 = vadd.f32 %v3473_v10, %v3167_v8  ;;  %v381_v14 = vpop.f32.mrb[7].mxu0 }
  0xe9   :  { %v277_v15 = vadd.f32 %v3155_v54, %v276_v12  ;;  %v382_v16 = vadd.f32 %v3167_v8, %v381_v14 }
  0xea   :  { %301 = vst.msk [vmem:[#allocation2 + $0x68] sm:$0xff] %vm170_vm2, %v282_v11  ;;  %422 = vst.msk [vmem:[#allocation2 + $0x88] sm:$0xff] %vm170_vm2, %v387_v13  ;;  %v652_v3 = vld [vmem:[#allocation2 + $0x40] sm:$0xff] }
  0xeb   :  { %300 = vst.msk [vmem:[#allocation2 + $0x60] sm:$0xff] %vm170_vm2, %v277_v15  ;;  %v3466_v17 = vpop.f32.mrb[8].mxu1  ;;  %421 = vst.msk [vmem:[#allocation2 + $0x80] sm:$0xff] %vm170_vm2, %v382_v16  ;;  %v3476_v18 = vpop.f32.mrb[8].mxu0 }
  0xec   :  { %v292_v19 = vadd.f32 %v3466_v17, %v3155_v54  ;;  %v286_v21 = vpop.f32.mrb[9].mxu1  ;;  %v397_v22 = vadd.f32 %v3476_v18, %v3167_v8  ;;  %v391_v24 = vpop.f32.mrb[9].mxu0 }
  0xed   :  { %v287_v25 = vadd.f32 %v3155_v54, %v286_v21  ;;  %v392_v27 = vadd.f32 %v3167_v8, %v391_v24 }
  0xee   :  { %303 = vst.msk [vmem:[#allocation2 + $0x78] sm:$0xff] %vm170_vm2, %v292_v19  ;;  %424 = vst.msk [vmem:[#allocation2 + $0x98] sm:$0xff] %vm170_vm2, %v397_v22 }
  0xef   :  { %302 = vst.msk [vmem:[#allocation2 + $0x70] sm:$0xff] %vm170_vm2, %v287_v25  ;;  %v3489_v30 = vpop.f32.mrb[10].mxu1  ;;  %423 = vst.msk [vmem:[#allocation2 + $0x90] sm:$0xff] %vm170_vm2, %v392_v27  ;;  %v3479_v31 = vpop.f32.mrb[10].mxu0 }
  0xf0   :  { %v512_v32 = vadd.f32 %v3489_v30, %v3179_v26  ;;  %v506_v33 = vpop.f32.mrb[11].mxu1  ;;  %v407_v37 = vadd.f32 %v3479_v31, %v3167_v8  ;;  %v401_v38 = vpop.f32.mrb[11].mxu0 }
  0xf1   :  { %v507_v40 = vadd.f32 %v3179_v26, %v506_v33  ;;  %v402_v41 = vadd.f32 %v3167_v8, %v401_v38 }
  0xf2   :  { %547 = vst.msk [vmem:[#allocation2 + $0xc8] sm:$0xff] %vm170_vm2, %v512_v32  ;;  %426 = vst.msk [vmem:[#allocation2 + $0xa8] sm:$0xff] %vm170_vm2, %v407_v37  ;;  %v728_v1 = vld [vmem:[#allocation2 + $0x80] sm:$0xff]  ;;  %v882_v37 = vld [vmem:[#allocation2 + $0x8] sm:$0xff] }
  0xf3   :  { %546 = vst.msk [vmem:[#allocation2 + $0xc0] sm:$0xff] %vm170_vm2, %v507_v40  ;;  %v3492_v43 = vpop.f32.mrb[12].mxu1  ;;  %425 = vst.msk [vmem:[#allocation2 + $0xa0] sm:$0xff] %vm170_vm2, %v402_v41  ;;  %v3482_v44 = vpop.f32.mrb[12].mxu0  ;;  %v961_v40 = vld [vmem:[#allocation2 + $0x48] sm:$0xff] }
  0xf4   :  { %v522_v46 = vadd.f32 %v3492_v43, %v3179_v26  ;;  %v516_v47 = vpop.f32.mrb[13].mxu1  ;;  %v417_v48 = vadd.f32 %v3482_v44, %v3167_v8  ;;  %v411_v49 = vpop.f32.mrb[13].mxu0 }
  0xf5   :  { %v517_v50 = vadd.f32 %v3179_v26, %v516_v47  ;;  %v412_v51 = vadd.f32 %v3167_v8, %v411_v49 }
  0xf6   :  { %549 = vst.msk [vmem:[#allocation2 + $0xd8] sm:$0xff] %vm170_vm2, %v522_v46  ;;  %428 = vst.msk [vmem:[#allocation2 + $0xb8] sm:$0xff] %vm170_vm2, %v417_v48 }
  0xf7   :  { %548 = vst.msk [vmem:[#allocation2 + $0xd0] sm:$0xff] %vm170_vm2, %v517_v50  ;;  %427 = vst.msk [vmem:[#allocation2 + $0xb0] sm:$0xff] %vm170_vm2, %v412_v51  ;;  %v3495_v52 = vpop.f32.mrb[14].mxu1  ;;  %v643_v54 = vpop.f32.mrb[14].mxu0  ;;  %v1037_v50 = vld [vmem:[#allocation2 + $0x88] sm:$0xff] }
  0xf8   :  { %v532_v55 = vadd.f32 %v3495_v52, %v3179_v26  ;;  %v647_v56 = vadd.f32 %v643_v54, %v573_v53  ;;  %v526_v57 = vpop.f32.mrb[15].mxu1  ;;  %v3509_v58 = vpop.f32.mrb[15].mxu0 }
  0xf9   :  { %v527_v59 = vadd.f32 %v3179_v26, %v526_v57  ;;  %v1110_v54 = vld [vmem:[#allocation2 + $0xc8] sm:$0xff] }
  0xfa   :  { %551 = vst.msk [vmem:[#allocation2 + $0xe8] sm:$0xff] %vm170_vm2, %v532_v55  ;;  %v648_v60 = vmul.f32 0.5, %v647_v56  ;;  %v801_v12 = vld [vmem:[#allocation2 + $0xc0] sm:$0xff] }
  0xfb   :  { %550 = vst.msk [vmem:[#allocation2 + $0xe0] sm:$0xff] %vm170_vm2, %v527_v59  ;;  %v3498_v61 = vpop.f32.mrb[16].mxu1 }
  0xfc   :  { %4081 = vtanh.f32 %v648_v60  ;;  %v542_v62 = vadd.f32 %v3498_v61, %v3179_v26  ;;  %v536_v63 = vpop.f32.mrb[17].mxu1 }
  0xfd   :  { %v537_v0 = vadd.f32 %v3179_v26, %v536_v63 }
  0xfe   :  { %553 = vst.msk [vmem:[#allocation2 + $0xf8] sm:$0xff] %vm170_vm2, %v542_v62 }
  0xff   :  { %552 = vst.msk [vmem:[#allocation2 + $0xf0] sm:$0xff] %vm170_vm2, %v537_v0  ;;  %v795_v2 = vpop.f32.mrb[16].mxu0  ;;  %v719_v4 = vpop.f32.mrb[18].mxu1 }
 0x100   :  { %v799_v5 = vadd.f32 %v795_v2, %v728_v1  ;;  %v723_v6 = vadd.f32 %v719_v4, %v652_v3  ;;  %v3520_v7 = vpop.f32.mrb[19].mxu1  ;;  %v3531_v8 = vpop.f32.mrb[17].mxu0 }
 0x102   :  { %4083 = vtanh.f32 %v799_v5  ;;  %v724_v9 = vmul.f32 0.5, %v723_v6 }
 0x104   :  { %4085 = vtanh.f32 %v724_v9 }
 0x106   :  { %v4082_v10 = vpop.eup %4081 }
 0x107   :  { %v650_v11 = vmul.f32 0.5, %v4082_v10  ;;  %v868_v13 = vpop.f32.mrb[20].mxu1  ;;  %v1191_v10 = vld [vmem:[#allocation2 + $0x10] sm:$0xff] }
 0x108   :  { %v872_v14 = vadd.f32 %v868_v13, %v801_v12  ;;  %v3542_v15 = vpop.f32.mrb[21].mxu1  ;;  %v1270_v12 = vld [vmem:[#allocation2 + $0x50] sm:$0xff] }
 0x109   :  { %v651_v16 = vadd.f32 0.5, %v650_v11 }
 0x10a   :  { %v873_v17 = vmul.f32 0.5, %v872_v14 }
 0x10c   :  { %v4084_v18 = vpop.eup %4083  ;;  %4087 = vtanh.f32 %v873_v17 }
 0x10d   :  { %v878_v19 = vmul.f32 %v4084_v18, %v651_v16 }
 0x10e   :  { %v4086_v21 = vpop.eup %4085 }
 0x10f   :  { %v726_v22 = vmul.f32 0.5, %v4086_v21  ;;  %v1346_v21 = vld [vmem:[#allocation2 + $0x90] sm:$0xff] }
 0x111   :  { %v727_v24 = vadd.f32 0.5, %v726_v22 }
 0x113   :  { %v877_v25 = vmul.f32 0.0, %v727_v24 }
 0x115   :  { %v879_v26 = vadd.f32 %v878_v19, %v877_v25 }
 0x116   :  { %v4088_v27 = vpop.eup %4087 }
 0x117   :  { %4089 = vtanh.f32 %v879_v26  ;;  %v875_v30 = vmul.f32 0.5, %v4088_v27 }
 0x119   :  { %v876_v31 = vadd.f32 0.5, %v875_v30 }
 0x121   :  { %v4090_v32 = vpop.eup %4089 }
 0x122   :  { %v881_v33 = vmul.f32 %v4090_v32, %v876_v31 }
 0x124   :  { %3552 = vmatmul.mubr.msk.f32.vlgmr.msra.gmra.mrb[18].mxu0 %vm170_vm2, %v881_v33  ;;  %3563 = vmatmul.mubr.msk.f32.vlgmr.msra.gmra.mrb[22].mxu1 %vm170_vm2, %v881_v33 }
 0x125   :  { %3916 = vmatpush3.bf16.msra.mxu0 %v4344_v36  ;;  %3922 = vmatpush3.bf16.msra.mxu1 %v4375_v42 }
 0x126   :  { %3917 = vmatprep.subr.bf16.mxu0 %v4165_v20  ;;  %3923 = vmatprep.subr.bf16.mxu1 %v4165_v20 }
 0x127   :  { %3573 = vmatprep.mubr.msk.f32.mxu0 %vm4166_vm1, %v4167_v35  ;;  %3584 = vmatprep.mubr.msk.f32.mxu1 %vm4166_vm1, %v4167_v35 }
 0x129   :  { %3919 = vmatpush3.bf16.msra.mxu0 %v4359_v39  ;;  %3925 = vmatpush3.bf16.msra.mxu1 %v4387_v45 }
 0x12a   :  { %3926 = vmatprep.subr.bf16.mxu0 %v4165_v20  ;;  %3932 = vmatprep.subr.bf16.mxu1 %v4165_v20 }
 0x12c   :  { %3574 = vmatmul.mubr.msk.f32.vlgmr.msra.gmra.mrb[20].mxu0 %vm170_vm2, %v881_v33  ;;  %3585 = vmatmul.mubr.msk.f32.vlgmr.msra.gmra.mrb[24].mxu1 %vm170_vm2, %v881_v33 }
 0x12d   :  { %3928 = vmatpush3.bf16.msra.mxu0 %v4284_v23  ;;  %3934 = vmatpush3.bf16.msra.mxu1 %v4313_v29 }
 0x12e   :  { %3929 = vmatprep.subr.bf16.mxu0 %v4165_v20  ;;  %3935 = vmatprep.subr.bf16.mxu1 %v4165_v20 }
 0x12f   :  { %3595 = vmatprep.mubr.msk.f32.mxu0 %vm4166_vm1, %v4167_v35  ;;  %3606 = vmatprep.mubr.msk.f32.mxu1 %vm4166_vm1, %v4167_v35 }
 0x131   :  { %3931 = vmatpush3.bf16.msra.mxu0 %v4304_v28  ;;  %3937 = vmatpush3.bf16.msra.mxu1 %v4336_v34 }
 0x132   :  { %3938 = vmatprep.subr.bf16.mxu0 %v4165_v20  ;;  %3944 = vmatprep.subr.bf16.mxu1 %v4165_v20 }
 0x1f7   :  { %v952_v38 = vpop.f32.mrb[18].mxu0  ;;  %v1028_v41 = vpop.f32.mrb[22].mxu1 }
 0x1f8   :  { %v956_v43 = vadd.f32 %v952_v38, %v882_v37  ;;  %v1032_v44 = vadd.f32 %v1028_v41, %v961_v40  ;;  %v3553_v46 = vpop.f32.mrb[19].mxu0  ;;  %v3564_v47 = vpop.f32.mrb[23].mxu1 }
 0x1fa   :  { %v957_v48 = vmul.f32 0.5, %v956_v43  ;;  %v1033_v49 = vmul.f32 0.5, %v1032_v44 }
 0x1fc   :  { %4091 = vtanh.f32 %v957_v48 }
 0x1fd   :  { %4093 = vtanh.f32 %v1033_v49 }
 0x1ff   :  { %v1104_v51 = vpop.f32.mrb[20].mxu0  ;;  %v1177_v52 = vpop.f32.mrb[24].mxu1 }
 0x200   :  { %v1108_v53 = vadd.f32 %v1104_v51, %v1037_v50  ;;  %v3575_v55 = vpop.f32.mrb[21].mxu0  ;;  %v3586_v56 = vpop.f32.mrb[25].mxu1  ;;  %v1181_v57 = vadd.f32 %v1177_v52, %v1110_v54  ;;  %v1500_v54 = vld [vmem:[#allocation2 + $0x18] sm:$0xff] }
 0x201   :  { %v1579_v56 = vld [vmem:[#allocation2 + $0x58] sm:$0xff] }
 0x202   :  { %4095 = vtanh.f32 %v1108_v53  ;;  %v1182_v58 = vmul.f32 0.5, %v1181_v57 }
 0x204   :  { %4097 = vtanh.f32 %v1182_v58 }
 0x206   :  { %v4092_v59 = vpop.eup %4091 }
 0x207   :  { %v4094_v60 = vpop.eup %4093  ;;  %v959_v61 = vmul.f32 0.5, %v4092_v59 }
 0x208   :  { %v1035_v62 = vmul.f32 0.5, %v4094_v60 }
 0x209   :  { %v960_v63 = vadd.f32 0.5, %v959_v61 }
 0x20a   :  { %v1036_v0 = vadd.f32 0.5, %v1035_v62 }
 0x20c   :  { %v4096_v1 = vpop.eup %4095  ;;  %v1186_v2 = vmul.f32 %v1036_v0, %v879_v26  ;;  %v1419_v26 = vld [vmem:[#allocation2 + $0xd0] sm:$0xff]  ;;  %v1655_v0 = vld [vmem:[#allocation2 + $0x98] sm:$0xff] }
 0x20d   :  { %v1187_v3 = vmul.f32 %v4096_v1, %v960_v63 }
 0x20e   :  { %v4098_v5 = vpop.eup %4097 }
 0x20f   :  { %v1188_v4 = vadd.f32 %v1187_v3, %v1186_v2  ;;  %v1184_v6 = vmul.f32 0.5, %v4098_v5 }
 0x211   :  { %4099 = vtanh.f32 %v1188_v4  ;;  %v1185_v7 = vadd.f32 0.5, %v1184_v6 }
 0x21b   :  { %v4100_v8 = vpop.eup %4099 }
 0x21c   :  { %v1190_v9 = vmul.f32 %v4100_v8, %v1185_v7 }
 0x21e   :  { %3596 = vmatmul.mubr.msk.f32.vlgmr.msra.gmra.mrb[22].mxu0 %vm170_vm2, %v1190_v9  ;;  %3607 = vmatmul.mubr.msk.f32.vlgmr.msra.gmra.mrb[26].mxu1 %vm170_vm2, %v1190_v9 }
 0x21f   :  { %3940 = vmatpush3.bf16.msra.mxu0 %v4344_v36  ;;  %3946 = vmatpush3.bf16.msra.mxu1 %v4375_v42 }
 0x220   :  { %3941 = vmatprep.subr.bf16.mxu0 %v4165_v20  ;;  %3947 = vmatprep.subr.bf16.mxu1 %v4165_v20 }
 0x221   :  { %3617 = vmatprep.mubr.msk.f32.mxu0 %vm4166_vm1, %v4167_v35  ;;  %3628 = vmatprep.mubr.msk.f32.mxu1 %vm4166_vm1, %v4167_v35 }
 0x223   :  { %3943 = vmatpush3.bf16.msra.mxu0 %v4359_v39  ;;  %3949 = vmatpush3.bf16.msra.mxu1 %v4387_v45 }
 0x224   :  { %3950 = vmatprep.subr.bf16.mxu0 %v4165_v20  ;;  %3956 = vmatprep.subr.bf16.mxu1 %v4165_v20 }
 0x226   :  { %3618 = vmatmul.mubr.msk.f32.vlgmr.msra.gmra.mrb[24].mxu0 %vm170_vm2, %v1190_v9  ;;  %3629 = vmatmul.mubr.msk.f32.vlgmr.msra.gmra.mrb[28].mxu1 %vm170_vm2, %v1190_v9 }
 0x227   :  { %3952 = vmatpush3.bf16.msra.mxu0 %v4284_v23  ;;  %3958 = vmatpush3.bf16.msra.mxu1 %v4313_v29 }
 0x228   :  { %3953 = vmatprep.subr.bf16.mxu0 %v4165_v20  ;;  %3959 = vmatprep.subr.bf16.mxu1 %v4165_v20 }
 0x229   :  { %3639 = vmatprep.mubr.msk.f32.mxu0 %vm4166_vm1, %v4167_v35  ;;  %3650 = vmatprep.mubr.msk.f32.mxu1 %vm4166_vm1, %v4167_v35 }
 0x22b   :  { %3955 = vmatpush3.bf16.msra.mxu0 %v4304_v28  ;;  %3961 = vmatpush3.bf16.msra.mxu1 %v4336_v34 }
 0x22c   :  { %3962 = vmatprep.subr.bf16.mxu0 %v4165_v20  ;;  %3968 = vmatprep.subr.bf16.mxu1 %v4165_v20 }
 0x2f1   :  { %v1261_v11 = vpop.f32.mrb[22].mxu0  ;;  %v1337_v13 = vpop.f32.mrb[26].mxu1 }
 0x2f2   :  { %v1265_v14 = vadd.f32 %v1261_v11, %v1191_v10  ;;  %v1341_v15 = vadd.f32 %v1337_v13, %v1270_v12  ;;  %v3597_v16 = vpop.f32.mrb[23].mxu0  ;;  %v3608_v17 = vpop.f32.mrb[27].mxu1 }
 0x2f4   :  { %v1266_v18 = vmul.f32 0.5, %v1265_v14  ;;  %v1342_v19 = vmul.f32 0.5, %v1341_v15 }
 0x2f6   :  { %4101 = vtanh.f32 %v1266_v18 }
 0x2f7   :  { %4103 = vtanh.f32 %v1342_v19 }
 0x2f9   :  { %v1413_v22 = vpop.f32.mrb[24].mxu0  ;;  %v1486_v24 = vpop.f32.mrb[28].mxu1 }
 0x2fa   :  { %v1417_v25 = vadd.f32 %v1413_v22, %v1346_v21  ;;  %v3619_v27 = vpop.f32.mrb[25].mxu0  ;;  %v3630_v30 = vpop.f32.mrb[29].mxu1  ;;  %v1490_v31 = vadd.f32 %v1486_v24, %v1419_v26  ;;  %v1809_v26 = vld [vmem:[#allocation2 + $0x20] sm:$0xff] }
 0x2fb   :  { %v1888_v30 = vld [vmem:[#allocation2 + $0x60] sm:$0xff] }
 0x2fc   :  { %4105 = vtanh.f32 %v1417_v25  ;;  %v1491_v32 = vmul.f32 0.5, %v1490_v31 }
 0x2fe   :  { %4107 = vtanh.f32 %v1491_v32 }
 0x300   :  { %v4102_v33 = vpop.eup %4101 }
 0x301   :  { %v4104_v37 = vpop.eup %4103  ;;  %v1268_v38 = vmul.f32 0.5, %v4102_v33 }
 0x302   :  { %v1344_v40 = vmul.f32 0.5, %v4104_v37 }
 0x303   :  { %v1269_v41 = vadd.f32 0.5, %v1268_v38 }
 0x304   :  { %v1345_v43 = vadd.f32 0.5, %v1344_v40 }
 0x306   :  { %v4106_v44 = vpop.eup %4105  ;;  %v1495_v46 = vmul.f32 %v1345_v43, %v1188_v4  ;;  %v1728_v4 = vld [vmem:[#allocation2 + $0xd8] sm:$0xff]  ;;  %v1964_v43 = vld [vmem:[#allocation2 + $0xa0] sm:$0xff] }
 0x307   :  { %v1496_v47 = vmul.f32 %v4106_v44, %v1269_v41 }
 0x308   :  { %v4108_v49 = vpop.eup %4107 }
 0x309   :  { %v1497_v48 = vadd.f32 %v1496_v47, %v1495_v46  ;;  %v1493_v50 = vmul.f32 0.5, %v4108_v49 }
 0x30b   :  { %4109 = vtanh.f32 %v1497_v48  ;;  %v1494_v51 = vadd.f32 0.5, %v1493_v50 }
 0x315   :  { %v4110_v52 = vpop.eup %4109 }
 0x316   :  { %v1499_v53 = vmul.f32 %v4110_v52, %v1494_v51 }
 0x318   :  { %3640 = vmatmul.mubr.msk.f32.vlgmr.msra.gmra.mrb[26].mxu0 %vm170_vm2, %v1499_v53  ;;  %3651 = vmatmul.mubr.msk.f32.vlgmr.msra.gmra.mrb[30].mxu1 %vm170_vm2, %v1499_v53 }
 0x319   :  { %3964 = vmatpush3.bf16.msra.mxu0 %v4344_v36  ;;  %3970 = vmatpush3.bf16.msra.mxu1 %v4375_v42 }
 0x31a   :  { %3965 = vmatprep.subr.bf16.mxu0 %v4165_v20  ;;  %3971 = vmatprep.subr.bf16.mxu1 %v4165_v20 }
 0x31b   :  { %3661 = vmatprep.mubr.msk.f32.mxu0 %vm4166_vm1, %v4167_v35  ;;  %3672 = vmatprep.mubr.msk.f32.mxu1 %vm4166_vm1, %v4167_v35 }
 0x31d   :  { %3967 = vmatpush3.bf16.msra.mxu0 %v4359_v39  ;;  %3973 = vmatpush3.bf16.msra.mxu1 %v4387_v45 }
 0x31e   :  { %3974 = vmatprep.subr.bf16.mxu0 %v4165_v20  ;;  %3980 = vmatprep.subr.bf16.mxu1 %v4165_v20 }
 0x320   :  { %3662 = vmatmul.mubr.msk.f32.vlgmr.msra.gmra.mrb[28].mxu0 %vm170_vm2, %v1499_v53  ;;  %3673 = vmatmul.mubr.msk.f32.vlgmr.msra.gmra.mrb[32].mxu1 %vm170_vm2, %v1499_v53 }
 0x321   :  { %3976 = vmatpush3.bf16.msra.mxu0 %v4284_v23  ;;  %3982 = vmatpush3.bf16.msra.mxu1 %v4313_v29 }
 0x322   :  { %3977 = vmatprep.subr.bf16.mxu0 %v4165_v20  ;;  %3983 = vmatprep.subr.bf16.mxu1 %v4165_v20 }
 0x323   :  { %3683 = vmatprep.mubr.msk.f32.mxu0 %vm4166_vm1, %v4167_v35  ;;  %3694 = vmatprep.mubr.msk.f32.mxu1 %vm4166_vm1, %v4167_v35 }
 0x325   :  { %3979 = vmatpush3.bf16.msra.mxu0 %v4304_v28  ;;  %3985 = vmatpush3.bf16.msra.mxu1 %v4336_v34 }
 0x326   :  { %3986 = vmatprep.subr.bf16.mxu0 %v4165_v20  ;;  %3992 = vmatprep.subr.bf16.mxu1 %v4165_v20 }
 0x3eb   :  { %v1570_v55 = vpop.f32.mrb[26].mxu0  ;;  %v1646_v57 = vpop.f32.mrb[30].mxu1 }
 0x3ec   :  { %v1574_v58 = vadd.f32 %v1570_v55, %v1500_v54  ;;  %v1650_v59 = vadd.f32 %v1646_v57, %v1579_v56  ;;  %v3641_v60 = vpop.f32.mrb[27].mxu0  ;;  %v3652_v61 = vpop.f32.mrb[31].mxu1 }
 0x3ee   :  { %v1575_v62 = vmul.f32 0.5, %v1574_v58  ;;  %v1651_v63 = vmul.f32 0.5, %v1650_v59 }
 0x3f0   :  { %4111 = vtanh.f32 %v1575_v62 }
 0x3f1   :  { %4113 = vtanh.f32 %v1651_v63 }
 0x3f3   :  { %v1722_v1 = vpop.f32.mrb[28].mxu0  ;;  %v1795_v2 = vpop.f32.mrb[32].mxu1 }
 0x3f4   :  { %v1726_v3 = vadd.f32 %v1722_v1, %v1655_v0  ;;  %v3663_v5 = vpop.f32.mrb[29].mxu0  ;;  %v3674_v6 = vpop.f32.mrb[33].mxu1  ;;  %v1799_v7 = vadd.f32 %v1795_v2, %v1728_v4  ;;  %v2118_v4 = vld [vmem:[#allocation2 + $0x28] sm:$0xff] }
 0x3f5   :  { %v2197_v6 = vld [vmem:[#allocation2 + $0x68] sm:$0xff] }
 0x3f6   :  { %4115 = vtanh.f32 %v1726_v3  ;;  %v1800_v8 = vmul.f32 0.5, %v1799_v7 }
 0x3f8   :  { %4117 = vtanh.f32 %v1800_v8 }
 0x3fa   :  { %v4112_v9 = vpop.eup %4111 }
 0x3fb   :  { %v4114_v10 = vpop.eup %4113  ;;  %v1577_v11 = vmul.f32 0.5, %v4112_v9 }
 0x3fc   :  { %v1653_v12 = vmul.f32 0.5, %v4114_v10 }
 0x3fd   :  { %v1578_v13 = vadd.f32 0.5, %v1577_v11 }
 0x3fe   :  { %v1654_v14 = vadd.f32 0.5, %v1653_v12 }
 0x400   :  { %v4116_v15 = vpop.eup %4115  ;;  %v1804_v16 = vmul.f32 %v1654_v14, %v1497_v48  ;;  %v2037_v48 = vld [vmem:[#allocation2 + $0xe0] sm:$0xff]  ;;  %v2273_v14 = vld [vmem:[#allocation2 + $0xa8] sm:$0xff] }
 0x401   :  { %v1805_v17 = vmul.f32 %v4116_v15, %v1578_v13 }
 0x402   :  { %v4118_v19 = vpop.eup %4117 }
 0x403   :  { %v1806_v18 = vadd.f32 %v1805_v17, %v1804_v16  ;;  %v1802_v21 = vmul.f32 0.5, %v4118_v19 }
 0x405   :  { %4119 = vtanh.f32 %v1806_v18  ;;  %v1803_v22 = vadd.f32 0.5, %v1802_v21 }
 0x40f   :  { %v4120_v24 = vpop.eup %4119 }
 0x410   :  { %v1808_v25 = vmul.f32 %v4120_v24, %v1803_v22 }
 0x412   :  { %3684 = vmatmul.mubr.msk.f32.vlgmr.msra.gmra.mrb[30].mxu0 %vm170_vm2, %v1808_v25  ;;  %3695 = vmatmul.mubr.msk.f32.vlgmr.msra.gmra.mrb[34].mxu1 %vm170_vm2, %v1808_v25 }
 0x413   :  { %3988 = vmatpush3.bf16.msra.mxu0 %v4344_v36  ;;  %3994 = vmatpush3.bf16.msra.mxu1 %v4375_v42 }
 0x414   :  { %3989 = vmatprep.subr.bf16.mxu0 %v4165_v20  ;;  %3995 = vmatprep.subr.bf16.mxu1 %v4165_v20 }
 0x415   :  { %3705 = vmatprep.mubr.msk.f32.mxu0 %vm4166_vm1, %v4167_v35  ;;  %3716 = vmatprep.mubr.msk.f32.mxu1 %vm4166_vm1, %v4167_v35 }
 0x417   :  { %3991 = vmatpush3.bf16.msra.mxu0 %v4359_v39  ;;  %3997 = vmatpush3.bf16.msra.mxu1 %v4387_v45 }
 0x418   :  { %3998 = vmatprep.subr.bf16.mxu0 %v4165_v20  ;;  %4004 = vmatprep.subr.bf16.mxu1 %v4165_v20 }
 0x41a   :  { %3706 = vmatmul.mubr.msk.f32.vlgmr.msra.gmra.mrb[32].mxu0 %vm170_vm2, %v1808_v25  ;;  %3717 = vmatmul.mubr.msk.f32.vlgmr.msra.gmra.mrb[36].mxu1 %vm170_vm2, %v1808_v25 }
 0x41b   :  { %4000 = vmatpush3.bf16.msra.mxu0 %v4284_v23  ;;  %4006 = vmatpush3.bf16.msra.mxu1 %v4313_v29 }
 0x41c   :  { %4001 = vmatprep.subr.bf16.mxu0 %v4165_v20  ;;  %4007 = vmatprep.subr.bf16.mxu1 %v4165_v20 }
 0x41d   :  { %3727 = vmatprep.mubr.msk.f32.mxu0 %vm4166_vm1, %v4167_v35  ;;  %3738 = vmatprep.mubr.msk.f32.mxu1 %vm4166_vm1, %v4167_v35 }
 0x41f   :  { %4003 = vmatpush3.bf16.msra.mxu0 %v4304_v28  ;;  %4009 = vmatpush3.bf16.msra.mxu1 %v4336_v34 }
 0x420   :  { %4010 = vmatprep.subr.bf16.mxu0 %v4165_v20  ;;  %4016 = vmatprep.subr.bf16.mxu1 %v4165_v20 }
 0x4e5   :  { %v1879_v27 = vpop.f32.mrb[30].mxu0  ;;  %v1955_v31 = vpop.f32.mrb[34].mxu1 }
 0x4e6   :  { %v1883_v32 = vadd.f32 %v1879_v27, %v1809_v26  ;;  %v1959_v33 = vadd.f32 %v1955_v31, %v1888_v30  ;;  %v3685_v37 = vpop.f32.mrb[31].mxu0  ;;  %v3696_v38 = vpop.f32.mrb[35].mxu1 }
 0x4e8   :  { %v1884_v40 = vmul.f32 0.5, %v1883_v32  ;;  %v1960_v41 = vmul.f32 0.5, %v1959_v33 }
 0x4ea   :  { %4121 = vtanh.f32 %v1884_v40 }
 0x4eb   :  { %4123 = vtanh.f32 %v1960_v41 }
 0x4ed   :  { %v2031_v44 = vpop.f32.mrb[32].mxu0  ;;  %v2104_v46 = vpop.f32.mrb[36].mxu1 }
 0x4ee   :  { %v2035_v47 = vadd.f32 %v2031_v44, %v1964_v43  ;;  %v3707_v49 = vpop.f32.mrb[33].mxu0  ;;  %v3718_v50 = vpop.f32.mrb[37].mxu1  ;;  %v2108_v51 = vadd.f32 %v2104_v46, %v2037_v48  ;;  %v2506_v48 = vld [vmem:[#allocation2 + $0x70] sm:$0xff] }
 0x4f0   :  { %4125 = vtanh.f32 %v2035_v47  ;;  %v2109_v52 = vmul.f32 0.5, %v2108_v51 }
 0x4f2   :  { %4127 = vtanh.f32 %v2109_v52 }
 0x4f4   :  { %v4122_v53 = vpop.eup %4121 }
 0x4f5   :  { %v4124_v54 = vpop.eup %4123  ;;  %v1886_v55 = vmul.f32 0.5, %v4122_v53 }
 0x4f6   :  { %v1962_v56 = vmul.f32 0.5, %v4124_v54 }
 0x4f7   :  { %v1887_v57 = vadd.f32 0.5, %v1886_v55 }
 0x4f8   :  { %v1963_v58 = vadd.f32 0.5, %v1962_v56  ;;  %v2582_v56 = vld [vmem:[#allocation2 + $0xb0] sm:$0xff] }
 0x4fa   :  { %v4126_v59 = vpop.eup %4125  ;;  %v2113_v60 = vmul.f32 %v1963_v58, %v1806_v18  ;;  %v2346_v18 = vld [vmem:[#allocation2 + $0xe8] sm:$0xff]  ;;  %v2655_v58 = vld [vmem:[#allocation2 + $0xf0] sm:$0xff] }
 0x4fb   :  { %v2114_v61 = vmul.f32 %v4126_v59, %v1887_v57 }
 0x4fc   :  { %v4128_v63 = vpop.eup %4127 }
 0x4fd   :  { %v2115_v62 = vadd.f32 %v2114_v61, %v2113_v60  ;;  %v2111_v0 = vmul.f32 0.5, %v4128_v63 }
 0x4ff   :  { %4129 = vtanh.f32 %v2115_v62  ;;  %v2112_v1 = vadd.f32 0.5, %v2111_v0 }
 0x509   :  { %v4130_v2 = vpop.eup %4129 }
 0x50a   :  { %v2117_v3 = vmul.f32 %v4130_v2, %v2112_v1 }
 0x50c   :  { %3728 = vmatmul.mubr.msk.f32.vlgmr.msra.gmra.mrb[34].mxu0 %vm170_vm2, %v2117_v3  ;;  %3739 = vmatmul.mubr.msk.f32.vlgmr.msra.gmra.mrb[38].mxu1 %vm170_vm2, %v2117_v3 }
 0x50d   :  { %4012 = vmatpush3.bf16.msra.mxu0 %v4344_v36  ;;  %4018 = vmatpush3.bf16.msra.mxu1 %v4375_v42 }
 0x50e   :  { %4013 = vmatprep.subr.bf16.mxu0 %v4165_v20  ;;  %4019 = vmatprep.subr.bf16.mxu1 %v4165_v20 }
 0x50f   :  { %3749 = vmatprep.mubr.msk.f32.mxu0 %vm4166_vm1, %v4167_v35  ;;  %3760 = vmatprep.mubr.msk.f32.mxu1 %vm4166_vm1, %v4167_v35 }
 0x511   :  { %4015 = vmatpush3.bf16.msra.mxu0 %v4359_v39  ;;  %4021 = vmatpush3.bf16.msra.mxu1 %v4387_v45 }
 0x512   :  { %4022 = vmatprep.subr.bf16.mxu0 %v4165_v20  ;;  %4028 = vmatprep.subr.bf16.mxu1 %v4165_v20 }
 0x514   :  { %3750 = vmatmul.mubr.msk.f32.vlgmr.msra.gmra.mrb[36].mxu0 %vm170_vm2, %v2117_v3  ;;  %3761 = vmatmul.mubr.msk.f32.vlgmr.msra.gmra.mrb[40].mxu1 %vm170_vm2, %v2117_v3 }
 0x515   :  { %4024 = vmatpush3.bf16.msra.mxu0 %v4284_v23  ;;  %4030 = vmatpush3.bf16.msra.mxu1 %v4313_v29 }
 0x516   :  { %4025 = vmatprep.subr.bf16.mxu0 %v4165_v20  ;;  %4031 = vmatprep.subr.bf16.mxu1 %v4165_v20 }
 0x517   :  { %3771 = vmatprep.mubr.msk.f32.mxu0 %vm4166_vm1, %v4167_v35  ;;  %3782 = vmatprep.mubr.msk.f32.mxu1 %vm4166_vm1, %v4167_v35 }
 0x519   :  { %4027 = vmatpush3.bf16.msra.mxu0 %v4304_v28  ;;  %4033 = vmatpush3.bf16.msra.mxu1 %v4336_v34 }
 0x51a   :  { %4034 = vmatprep.subr.bf16.mxu0 %v4165_v20  ;;  %4040 = vmatprep.subr.bf16.mxu1 %v4165_v20 }
 0x5df   :  { %v2188_v5 = vpop.f32.mrb[34].mxu0  ;;  %v2264_v7 = vpop.f32.mrb[38].mxu1 }
 0x5e0   :  { %v2192_v8 = vadd.f32 %v2188_v5, %v2118_v4  ;;  %v2268_v9 = vadd.f32 %v2264_v7, %v2197_v6  ;;  %v3729_v10 = vpop.f32.mrb[35].mxu0  ;;  %v3740_v11 = vpop.f32.mrb[39].mxu1 }
 0x5e2   :  { %v2193_v12 = vmul.f32 0.5, %v2192_v8  ;;  %v2269_v13 = vmul.f32 0.5, %v2268_v9 }
 0x5e4   :  { %4131 = vtanh.f32 %v2193_v12 }
 0x5e5   :  { %4133 = vtanh.f32 %v2269_v13 }
 0x5e7   :  { %v2340_v15 = vpop.f32.mrb[36].mxu0  ;;  %v2413_v16 = vpop.f32.mrb[40].mxu1 }
 0x5e8   :  { %v2344_v17 = vadd.f32 %v2340_v15, %v2273_v14  ;;  %v3751_v19 = vpop.f32.mrb[37].mxu0  ;;  %v3762_v21 = vpop.f32.mrb[41].mxu1  ;;  %v2417_v22 = vadd.f32 %v2413_v16, %v2346_v18  ;;  %v2736_v15 = vld [vmem:[#allocation2 + $0x38] sm:$0xff] }
 0x5ea   :  { %4135 = vtanh.f32 %v2344_v17  ;;  %v2418_v24 = vmul.f32 0.5, %v2417_v22  ;;  %v2815_v17 = vld [vmem:[#allocation2 + $0x78] sm:$0xff] }
 0x5ec   :  { %4137 = vtanh.f32 %v2418_v24 }
 0x5ee   :  { %v4132_v25 = vpop.eup %4131 }
 0x5ef   :  { %v4134_v26 = vpop.eup %4133  ;;  %v2195_v27 = vmul.f32 0.5, %v4132_v25 }
 0x5f0   :  { %v2271_v30 = vmul.f32 0.5, %v4134_v26  ;;  %v2891_v26 = vld [vmem:[#allocation2 + $0xb8] sm:$0xff] }
 0x5f1   :  { %v2196_v31 = vadd.f32 0.5, %v2195_v27 }
 0x5f2   :  { %v2272_v32 = vadd.f32 0.5, %v2271_v30 }
 0x5f4   :  { %v4136_v33 = vpop.eup %4135  ;;  %v2422_v37 = vmul.f32 %v2272_v32, %v2115_v62  ;;  %v2964_v32 = vld [vmem:[#allocation2 + $0xf8] sm:$0xff] }
 0x5f5   :  { %v2423_v38 = vmul.f32 %v4136_v33, %v2196_v31 }
 0x5f6   :  { %v4138_v41 = vpop.eup %4137 }
 0x5f7   :  { %v2424_v40 = vadd.f32 %v2423_v38, %v2422_v37  ;;  %v2420_v43 = vmul.f32 0.5, %v4138_v41 }
 0x5f9   :  { %4139 = vtanh.f32 %v2424_v40  ;;  %v2421_v44 = vadd.f32 0.5, %v2420_v43 }
 0x603   :  { %v4140_v46 = vpop.eup %4139 }
 0x604   :  { %v2426_v47 = vmul.f32 %v4140_v46, %v2421_v44 }
 0x606   :  { %3772 = vmatmul.mubr.msk.f32.vlgmr.msra.gmra.mrb[38].mxu0 %vm170_vm2, %v2426_v47  ;;  %3783 = vmatmul.mubr.msk.f32.vlgmr.msra.gmra.mrb[42].mxu1 %vm170_vm2, %v2426_v47 }
 0x607   :  { %4036 = vmatpush3.bf16.msra.mxu0 %v4344_v36  ;;  %4042 = vmatpush3.bf16.msra.mxu1 %v4375_v42 }
 0x608   :  { %4037 = vmatprep.subr.bf16.mxu0 %v4165_v20  ;;  %4043 = vmatprep.subr.bf16.mxu1 %v4165_v20 }
 0x609   :  { %3793 = vmatprep.mubr.msk.f32.mxu0 %vm4166_vm1, %v4167_v35  ;;  %3804 = vmatprep.mubr.msk.f32.mxu1 %vm4166_vm1, %v4167_v35 }
 0x60b   :  { %4039 = vmatpush3.bf16.msra.mxu0 %v4359_v39  ;;  %4045 = vmatpush3.bf16.msra.mxu1 %v4387_v45 }
 0x60c   :  { %4046 = vmatprep.subr.bf16.mxu0 %v4165_v20  ;;  %4052 = vmatprep.subr.bf16.mxu1 %v4165_v20 }
 0x60e   :  { %3794 = vmatmul.mubr.msk.f32.vlgmr.msra.gmra.mrb[40].mxu0 %vm170_vm2, %v2426_v47  ;;  %3805 = vmatmul.mubr.msk.f32.vlgmr.msra.gmra.mrb[44].mxu1 %vm170_vm2, %v2426_v47 }
 0x60f   :  { %4048 = vmatpush3.bf16.msra.mxu0 %v4284_v23  ;;  %4054 = vmatpush3.bf16.msra.mxu1 %v4313_v29  ;;  %v2427_v23 = vld [vmem:[#allocation2 + $0x30] sm:$0xff] }
 0x610   :  { %4049 = vmatprep.subr.bf16.mxu0 %v4165_v20  ;;  %4055 = vmatprep.subr.bf16.mxu1 %v4165_v20 }
 0x611   :  { %3815 = vmatprep.mubr.msk.f32.mxu0 %vm4166_vm1, %v4167_v35  ;;  %3826 = vmatprep.mubr.msk.f32.mxu1 %vm4166_vm1, %v4167_v35 }
 0x613   :  { %4051 = vmatpush3.bf16.msra.mxu0 %v4304_v28  ;;  %4057 = vmatpush3.bf16.msra.mxu1 %v4336_v34 }
 0x614   :  { %4058 = vmatprep.subr.bf16.mxu0 %v4165_v20  ;;  %4064 = vmatprep.subr.bf16.mxu1 %v4165_v20 }
 0x6d9   :  { %v2497_v29 = vpop.f32.mrb[38].mxu0  ;;  %v2573_v49 = vpop.f32.mrb[42].mxu1 }
 0x6da   :  { %v2501_v50 = vadd.f32 %v2497_v29, %v2427_v23  ;;  %v2577_v51 = vadd.f32 %v2573_v49, %v2506_v48  ;;  %v3773_v52 = vpop.f32.mrb[39].mxu0  ;;  %v3784_v53 = vpop.f32.mrb[43].mxu1 }
 0x6dc   :  { %v2502_v54 = vmul.f32 0.5, %v2501_v50  ;;  %v2578_v55 = vmul.f32 0.5, %v2577_v51 }
 0x6de   :  { %4141 = vtanh.f32 %v2502_v54 }
 0x6df   :  { %4143 = vtanh.f32 %v2578_v55 }
 0x6e1   :  { %v2649_v28 = vpop.f32.mrb[40].mxu0  ;;  %v2722_v57 = vpop.f32.mrb[44].mxu1 }
 0x6e2   :  { %v2653_v34 = vadd.f32 %v2649_v28, %v2582_v56  ;;  %v3795_v59 = vpop.f32.mrb[41].mxu0  ;;  %v3806_v60 = vpop.f32.mrb[45].mxu1  ;;  %v2726_v61 = vadd.f32 %v2722_v57, %v2655_v58  ;;  %v3228_v56 = vld [vmem:[%s4661_s5] ss:$0 sm:$0xff] }
 0x6e4   :  { %4145 = vtanh.f32 %v2653_v34  ;;  %v2727_v62 = vmul.f32 0.5, %v2726_v61 }
 0x6e6   :  { %4147 = vtanh.f32 %v2727_v62 }
 0x6e8   :  { %v4142_v63 = vpop.eup %4141 }
 0x6e9   :  { %v4144_v0 = vpop.eup %4143  ;;  %v2504_v1 = vmul.f32 0.5, %v4142_v63 }
 0x6ea   :  { %v2580_v2 = vmul.f32 0.5, %v4144_v0 }
 0x6eb   :  { %v2505_v3 = vadd.f32 0.5, %v2504_v1 }
 0x6ec   :  { %v2581_v4 = vadd.f32 0.5, %v2580_v2 }
 0x6ee   :  { %v4146_v5 = vpop.eup %4145  ;;  %v2731_v6 = vmul.f32 %v2581_v4, %v2424_v40 }
 0x6ef   :  { %v2732_v7 = vmul.f32 %v4146_v5, %v2505_v3 }
 0x6f0   :  { %v4148_v9 = vpop.eup %4147 }
 0x6f1   :  { %v2733_v8 = vadd.f32 %v2732_v7, %v2731_v6  ;;  %v2729_v10 = vmul.f32 0.5, %v4148_v9 }
 0x6f3   :  { %4149 = vtanh.f32 %v2733_v8  ;;  %v2730_v11 = vadd.f32 0.5, %v2729_v10 }
 0x6fd   :  { %v4150_v12 = vpop.eup %4149 }
 0x6fe   :  { %v2735_v13 = vmul.f32 %v4150_v12, %v2730_v11 }
 0x700   :  { %3816 = vmatmul.mubr.msk.f32.vlgmr.msra.gmra.mrb[42].mxu0 %vm170_vm2, %v2735_v13  ;;  %3827 = vmatmul.mubr.msk.f32.vlgmr.msra.gmra.mrb[46].mxu1 %vm170_vm2, %v2735_v13 }
 0x701   :  { %4060 = vmatpush3.bf16.msra.mxu0 %v4344_v36  ;;  %4066 = vmatpush3.bf16.msra.mxu1 %v4375_v42  ;;  %v3045_v36 = vld [vmem:[%s4660_s4] sm:$0xff]  ;;  %v3046_v42 = vld [vmem:[%s4660_s4 + $0x8] sm:$0xff] }
 0x702   :  { %4061 = vmatprep.subr.bf16.mxu0 %v4165_v20  ;;  %4067 = vmatprep.subr.bf16.mxu1 %v4165_v20 }
 0x703   :  { %3837 = vmatprep.mubr.msk.f32.mxu0 %vm4166_vm1, %v4167_v35  ;;  %3848 = vmatprep.mubr.msk.f32.mxu1 %vm4166_vm1, %v4167_v35 }
 0x705   :  { %4063 = vmatpush3.bf16.msra.mxu0 %v4359_v39  ;;  %4069 = vmatpush3.bf16.msra.mxu1 %v4387_v45  ;;  %v4071_v39 = vpack.c.bf16 %v3046_v42, %v3045_v36  ;;  %v3047_v45 = vld [vmem:[%s4660_s4 + $0x10] sm:$0xff] }
 0x706   :  { %4070 = vmatprep.subr.bf16.mxu0 %v4165_v20 }
 0x708   :  { %3838 = vmatmul.mubr.msk.f32.vlgmr.msra.gmra.mrb[44].mxu0 %vm170_vm2, %v2735_v13  ;;  %3849 = vmatmul.mubr.msk.f32.vlgmr.msra.gmra.mrb[48].mxu1 %vm170_vm2, %v2735_v13 }
 0x709   :  { %3859 = vmatprep.mubr.msk.f32.mxu0 %vm4166_vm1, %v4167_v35  ;;  %4072 = vmatpush3.bf16.msra.mxu0 %v4071_v39  ;;  %v3048_v35 = vld [vmem:[%s4660_s4 + $0x18] sm:$0xff] }
 0x70a   :  { %4073 = vmatprep.subr.bf16.mxu0 %v4165_v20  ;;  %v4074_v14 = vpack.c.bf16 %v3048_v35, %v3047_v45 }
 0x70d   :  { %4075 = vmatpush3.bf16.msra.mxu0 %v4074_v14 }
 0x7d3   :  { %v2806_v16 = vpop.f32.mrb[42].mxu0  ;;  %v2882_v18 = vpop.f32.mrb[46].mxu1 }
 0x7d4   :  { %v2810_v19 = vadd.f32 %v2806_v16, %v2736_v15  ;;  %v2886_v21 = vadd.f32 %v2882_v18, %v2815_v17  ;;  %v3817_v22 = vpop.f32.mrb[43].mxu0  ;;  %v3828_v24 = vpop.f32.mrb[47].mxu1 }
 0x7d6   :  { %v2811_v25 = vmul.f32 0.5, %v2810_v19  ;;  %v2887_v20 = vmul.f32 0.5, %v2886_v21 }
 0x7d8   :  { %4151 = vtanh.f32 %v2811_v25 }
 0x7d9   :  { %4153 = vtanh.f32 %v2887_v20 }
 0x7db   :  { %v2958_v27 = vpop.f32.mrb[44].mxu0  ;;  %v3031_v30 = vpop.f32.mrb[48].mxu1 }
 0x7dc   :  { %v2962_v31 = vadd.f32 %v2958_v27, %v2891_v26  ;;  %v3839_v33 = vpop.f32.mrb[45].mxu0  ;;  %v3850_v37 = vpop.f32.mrb[49].mxu1  ;;  %v3035_v38 = vadd.f32 %v3031_v30, %v2964_v32 }
 0x7de   :  { %4155 = vtanh.f32 %v2962_v31  ;;  %v3036_v40 = vmul.f32 0.5, %v3035_v38 }
 0x7e0   :  { %4157 = vtanh.f32 %v3036_v40 }
 0x7e2   :  { %v4152_v41 = vpop.eup %4151 }
 0x7e3   :  { %v4154_v43 = vpop.eup %4153  ;;  %v2813_v44 = vmul.f32 0.5, %v4152_v41 }
 0x7e4   :  { %v2889_v46 = vmul.f32 0.5, %v4154_v43 }
 0x7e5   :  { %v2814_v47 = vadd.f32 0.5, %v2813_v44 }
 0x7e6   :  { %v2890_v23 = vadd.f32 0.5, %v2889_v46 }
 0x7e8   :  { %v4156_v29 = vpop.eup %4155  ;;  %v3040_v48 = vmul.f32 %v2890_v23, %v2733_v8 }
 0x7e9   :  { %v3041_v49 = vmul.f32 %v4156_v29, %v2814_v47 }
 0x7ea   :  { %v4158_v51 = vpop.eup %4157 }
 0x7eb   :  { %v3042_v50 = vadd.f32 %v3041_v49, %v3040_v48  ;;  %v3038_v52 = vmul.f32 0.5, %v4158_v51 }
 0x7ed   :  { %4159 = vtanh.f32 %v3042_v50  ;;  %v3039_v53 = vadd.f32 0.5, %v3038_v52 }
 0x7f7   :  { %v4160_v54 = vpop.eup %4159 }
 0x7f8   :  { %v3044_v55 = vmul.f32 %v4160_v54, %v3039_v53 }
 0x7fa   :  { %3860 = vmatmul.mubr.msk.f32.vlgmr.msra.gmra.mrb[46].mxu0 %vm170_vm2, %v3044_v55 }
 0x8cd   :  { %v3125_v28 = vpop.f32.mrb[46].mxu0 }
 0x8ce   :  { %v3126_v57 = vadd.f32 %v3228_v56, %v3125_v28  ;;  %v3861_v34 = vpop.f32.mrb[47].mxu0 }
 0x8d0   :  { %3129 = vmax.xlane.f32.xlu0 %v3126_v57 }
 0x95d   :  { %v3130_v58 = vpop.xlane.xlu0 %3129 }
 0x95e   :  { %v3131_v59 = vsub.f32 %v3126_v57, %v3130_v58 }
 0x960   :  { %v3132_v60 = vmul.f32 1.442695, %v3131_v59 }
 0x962   :  { %4161 = vpow2.f32 %v3132_v60 }
 0x96c   :  { %v4162_v61 = vpop.eup %4161 }
 0x96d   :  { %3134 = vadd.xlane.f32.xlu0 %v4162_v61 }
 0x9fa   :  { %v3135_v62 = vpop.xlane.xlu0 %3134 }
 0x9fb   :  { %4163 = vrcp.f32 %v3135_v62 }
 0xa05   :  { %v4164_v63 = vpop.eup %4163 }
 0xa06   :  { %v3137_v0 = vmul.f32 %v4164_v63, %v4162_v61 }
 0xa08   :  { %3138 = vst [vmem:[%s4662_s6] sm:$0xff] %v3137_v0 }

</bundles_post_ra>
